<compile_context>
chip_gen: v6e
topology: v6e:2x2x1
jax: 0.10.0
libtpu: 0.0.40
codegen_flags: <defaults>
</compile_context>

<pallas_src>
import jax
import jax.numpy as jnp
from jax.experimental import pallas as pl
from jax.experimental.pallas import tpu as pltpu

_CRP = 128  # lane-padded squeeze width for the channel-attention MLP


def _pick_block_b(batch, H, WC, crp=_CRP, vmem_budget=20 * 1024 * 1024):
    """Pick the per-grid-step batch tile.

    No grid>=2 requirement (single-TC v5e/v6e gain nothing from it; on v7x
    splitting a tiny batch across both TCs loses to one fuller matmul).  Take
    the largest divisor of `batch` whose per-step VMEM footprint stays under a
    conservative budget; keep >= 2 grid steps only if each step still fills
    the MXU M dimension (bt*H >= 256).
    """
    weight_bytes = (2 * 3 * WC * WC + 2 * crp * WC + 4 * WC + crp) * 4

    def fits(bt):
        act = bt * H * WC * 4  # one (bt, H, W*C) f32 activation slab
        # in+out blocks (double-buffered) + LHS scratch (3x) + r1/r2/temps (~4x)
        return weight_bytes + 11 * act <= vmem_budget

    divisors = [d for d in range(1, batch + 1) if batch % d == 0 and fits(d)]
    if not divisors:
        return 1
    split_ok = [d for d in divisors if d * H >= 256 and batch // d >= 2]
    return max(split_ok) if split_ok else max(divisors)


def _banded_conv_weight(w_oihw, width):
    """(C_out, C_in, 3, 3) OIHW conv weight -> (3*W*C_in, W*C_out) banded matrix.

    Row index    = kh*(W*C_in) + w_in*C_in + c_in
    Column index = w_out*C_out + c_out
    value        = w[c_out, c_in, kh, w_in - w_out + 1]   (0 outside the band)

    so a SAME 3x3 conv becomes  out[h, :] = [x[h-1,:], x[h,:], x[h+1,:]] @ bw
    with zero rows at the H boundary (dx taps and the W boundary are encoded
    in the band structure).
    """
    c_out, c_in, kh, kw = w_oihw.shape
    kw_i = jnp.arange(kw)[:, None, None]
    wi_i = jnp.arange(width)[None, :, None]
    wo_i = jnp.arange(width)[None, None, :]
    band = (wi_i == wo_i + kw_i - 1).astype(w_oihw.dtype)          # (3, W, W)
    bw = jnp.einsum('xaw,oihx->haiwo', band, w_oihw)               # (kh, wi, ci, wo, co)
    return bw.reshape(kh * width * c_in, width * c_out)


def rcab_pallas(x, w1, b1, w2, b2, wd, bd, wu, bu, *, block_b=None):
    """RCAB forward.

    x      : (B, C, H, W) float32 (NCHW, as in the PyTorch module)
    w1, w2 : (C, C, 3, 3) OIHW conv weights ; b1, b2 : (C,)
    wd     : (C//r, C)  squeeze 1x1-conv weight ; bd : (C//r,)
    wu     : (C, C//r)  excite  1x1-conv weight ; bu : (C,)
    """
    B, C, H, W = x.shape
    WC = W * C
    Cr = wd.shape[0]
    if Cr > _CRP:
        raise ValueError("channel//reduction must be <= 128")
    bt = _pick_block_b(B, H, WC) if block_b is None else block_b
    if B % bt != 0:
        raise ValueError("block_b must divide the batch size")

    # ---- host-side parameter / layout preparation (plain XLA, tiny) ----
    # TODO(synk): inside a full RCAN stack, keep activations in this lane-dense
    # (B, H, W*C) layout across consecutive RCABs; transpose only at entry/exit.
    x_l = jnp.transpose(x, (0, 2, 3, 1)).reshape(B, H, WC)          # lane-dense

    bw1 = _banded_conv_weight(w1, W)                                # (3*W*C, W*C)
    bw2 = _banded_conv_weight(w2, W)
    b1_t = jnp.tile(b1, W)[None, :]                                 # (1, W*C)
    b2_t = jnp.tile(b2, W)[None, :]
    # CALayer 1x1 convs: W-average / W-broadcast folded in, lane-padded to 128.
    wd_p = jnp.zeros((WC, _CRP), jnp.float32).at[:, :Cr].set(
        jnp.tile(wd.T / W, (W, 1)))                                 # (W*C, 128)
    bd_p = jnp.zeros((1, _CRP), jnp.float32).at[0, :Cr].set(bd)     # (1, 128)
    wu_p = jnp.zeros((_CRP, WC), jnp.float32).at[:Cr, :].set(
        jnp.tile(wu.T, (1, W)))                                     # (128, W*C)
    bu_t = jnp.tile(bu, W)[None, :]                                 # (1, W*C)

    def kernel(x_ref, bw1_ref, b1_ref, bw2_ref, b2_ref,
               wd_ref, bd_ref, wu_ref, bu_ref, out_ref, lhs_scr):
        zrow = jnp.zeros((1, WC), jnp.float32)

        def stage(src_flat):                     # (bt*H, W*C) -> 3 LHS bands
            # middle band (kh=1): every row, one lane-aligned store
            lhs_scr[:, WC:2 * WC] = src_flat
            for b in range(bt):                  # small static loop, halo rows
                base = b * H
                # top band (kh=0): out row h reads input row h-1; row 0 = halo
                lhs_scr[base:base + 1, 0:WC] = zrow
                lhs_scr[base + 1:base + H, 0:WC] = src_flat[base:base + H - 1, :]
                # bottom band (kh=2): out row h reads row h+1; row H-1 = halo
                lhs_scr[base:base + H - 1, 2 * WC:3 * WC] = \
                    src_flat[base + 1:base + H, :]
                lhs_scr[base + H - 1:base + H, 2 * WC:3 * WC] = zrow

        xv = x_ref[...].astype(jnp.float32)                     # (bt, H, W*C)

        # conv1 + ReLU : single (bt*H, 3WC) @ (3WC, WC) matmul
        stage(xv.reshape(bt * H, WC))
        r1 = jnp.maximum(
            jnp.dot(lhs_scr[...], bw1_ref[...],
                    preferred_element_type=jnp.float32) + b1_ref[...], 0.0)

        # conv2 (reuse the same LHS scratch)
        stage(r1)
        r2 = (jnp.dot(lhs_scr[...], bw2_ref[...],
                      preferred_element_type=jnp.float32) + b2_ref[...])
        r2b = r2.reshape(bt, H, WC)

        # CALayer: global average pool (W-mean folded into wd_p) + lane-dense
        # squeeze/excite (Cr padded to 128 lanes; pad lanes stay exactly zero).
        m = jnp.mean(r2b, axis=1)                                # (bt, W*C)
        z = jnp.maximum(
            jnp.dot(m, wd_ref[...], preferred_element_type=jnp.float32)
            + bd_ref[...], 0.0)                                  # (bt, 128)
        s = jax.nn.sigmoid(
            jnp.dot(z, wu_ref[...], preferred_element_type=jnp.float32)
            + bu_ref[...])                                       # (bt, W*C)

        # channel scaling + residual add, lane-dense store
        out_ref[...] = (r2b * s[:, None, :] + xv).astype(out_ref.dtype)

    const = dict(pipeline_mode=pl.Buffered(1))   # fetched once -> single-buffer
    grid_spec = pltpu.PrefetchScalarGridSpec(
        num_scalar_prefetch=0,
        grid=(B // bt,),
        in_specs=[
            pl.BlockSpec((bt, H, WC), lambda i: (i, 0, 0)),
            pl.BlockSpec((3 * WC, WC), lambda i: (0, 0), **const),
            pl.BlockSpec((1, WC), lambda i: (0, 0), **const),
            pl.BlockSpec((3 * WC, WC), lambda i: (0, 0), **const),
            pl.BlockSpec((1, WC), lambda i: (0, 0), **const),
            pl.BlockSpec((WC, _CRP), lambda i: (0, 0), **const),
            pl.BlockSpec((1, _CRP), lambda i: (0, 0), **const),
            pl.BlockSpec((_CRP, WC), lambda i: (0, 0), **const),
            pl.BlockSpec((1, WC), lambda i: (0, 0), **const),
        ],
        out_specs=pl.BlockSpec((bt, H, WC), lambda i: (i, 0, 0)),
        scratch_shapes=[pltpu.VMEM((bt * H, 3 * WC), jnp.float32)],
    )

    out_l = pl.pallas_call(
        kernel,
        out_shape=jax.ShapeDtypeStruct((B, H, WC), x.dtype),
        grid_spec=grid_spec,
        compiler_params=pltpu.CompilerParams(
            dimension_semantics=("parallel",),
            vmem_limit_bytes=32 * 1024 * 1024),
    )(x_l, bw1, b1_t, bw2, b2_t, wd_p, bd_p, wu_p, bu_t)

    return out_l.reshape(B, H, W, C).transpose(0, 3, 1, 2)          # back to NCHW


def rcab_reference(x, w1, b1, w2, b2, wd, bd, wu, bu):
    """Pure-JAX NCHW reference matching the PyTorch RCAB forward."""
    dn = ('NCHW', 'OIHW', 'NCHW')
    h = jax.lax.conv_general_dilated(x, w1, (1, 1), 'SAME',
                                     dimension_numbers=dn)
    h = jnp.maximum(h + b1.reshape(1, -1, 1, 1), 0.0)
    h = jax.lax.conv_general_dilated(h, w2, (1, 1), 'SAME',
                                     dimension_numbers=dn)
    h = h + b2.reshape(1, -1, 1, 1)
    y = jnp.mean(h, axis=(2, 3), keepdims=True)                     # (B, C, 1, 1)
    z = jnp.maximum(jnp.einsum('bcij,dc->bdij', y, wd)
                    + bd.reshape(1, -1, 1, 1), 0.0)
    s = jax.nn.sigmoid(jnp.einsum('bdij,cd->bcij', z, wu)
                       + bu.reshape(1, -1, 1, 1))
    return h * s + x


if __name__ == "__main__":
    # RCAB(conv=default_conv, n_feat=16, kernel_size=3, reduction=4), NCHW.
    B, H, W = 2, 16, 16
    n_feat, reduction = 16, 4
    Cr = n_feat // reduction

    key = jax.random.PRNGKey(0)
    ks = jax.random.split(key, 9)
    x = jax.random.normal(ks[0], (B, n_feat, H, W), jnp.float32)

    w1 = 0.1 * jax.random.normal(ks[1], (n_feat, n_feat, 3, 3), jnp.float32)  # OIHW
    b1 = 0.1 * jax.random.normal(ks[2], (n_feat,), jnp.float32)
    w2 = 0.1 * jax.random.normal(ks[3], (n_feat, n_feat, 3, 3), jnp.float32)
    b2 = 0.1 * jax.random.normal(ks[4], (n_feat,), jnp.float32)
    wd = 0.1 * jax.random.normal(ks[5], (Cr, n_feat), jnp.float32)            # squeeze 1x1
    bd = 0.1 * jax.random.normal(ks[6], (Cr,), jnp.float32)
    wu = 0.1 * jax.random.normal(ks[7], (n_feat, Cr), jnp.float32)            # excite 1x1
    bu = 0.1 * jax.random.normal(ks[8], (n_feat,), jnp.float32)

    out = rcab_pallas(x, w1, b1, w2, b2, wd, bd, wu, bu)
    out = jax.block_until_ready(out)

    ref = rcab_reference(x, w1, b1, w2, b2, wd, bd, wu, bu)
    assert out.shape == ref.shape and out.dtype == ref.dtype
    assert jnp.allclose(out, ref, rtol=1e-4, atol=1e-4), "mismatch vs reference"

    print("KERNEL_OK")
</pallas_src>

<mosaic_0001>
module attributes {stable_mosaic.version = 11 : i64} {
  func.func @kernel(%arg0: i32, %arg1: memref<2x16x256xf32, #tpu.memory_space<vmem>>, %arg2: memref<768x256xf32, #tpu.memory_space<vmem>>, %arg3: memref<1x256xf32, #tpu.memory_space<vmem>>, %arg4: memref<768x256xf32, #tpu.memory_space<vmem>>, %arg5: memref<1x256xf32, #tpu.memory_space<vmem>>, %arg6: memref<256x128xf32, #tpu.memory_space<vmem>>, %arg7: memref<1x128xf32, #tpu.memory_space<vmem>>, %arg8: memref<128x256xf32, #tpu.memory_space<vmem>>, %arg9: memref<1x256xf32, #tpu.memory_space<vmem>>, %arg10: memref<2x16x256xf32, #tpu.memory_space<vmem>>, %arg11: memref<32x768xf32, #tpu.memory_space<vmem>>) attributes {dimension_semantics = [#tpu.dimension_semantics<parallel>], iteration_bounds = array<i64: 1>, scalar_prefetch = 0 : i64, scratch_operands = 1 : i64, tpu.core_type = #tpu.core_type<tc>, window_params = [{transform_indices = @transform_0, window_bounds = array<i64: 2, 16, 256>}, {pipeline_mode = #tpu.pipeline_mode<synchronous>, transform_indices = @transform_1, window_bounds = array<i64: 768, 256>}, {pipeline_mode = #tpu.pipeline_mode<synchronous>, transform_indices = @transform_2, window_bounds = array<i64: 1, 256>}, {pipeline_mode = #tpu.pipeline_mode<synchronous>, transform_indices = @transform_3, window_bounds = array<i64: 768, 256>}, {pipeline_mode = #tpu.pipeline_mode<synchronous>, transform_indices = @transform_4, window_bounds = array<i64: 1, 256>}, {pipeline_mode = #tpu.pipeline_mode<synchronous>, transform_indices = @transform_5, window_bounds = array<i64: 256, 128>}, {pipeline_mode = #tpu.pipeline_mode<synchronous>, transform_indices = @transform_6, window_bounds = array<i64: 1, 128>}, {pipeline_mode = #tpu.pipeline_mode<synchronous>, transform_indices = @transform_7, window_bounds = array<i64: 128, 256>}, {pipeline_mode = #tpu.pipeline_mode<synchronous>, transform_indices = @transform_8, window_bounds = array<i64: 1, 256>}, {transform_indices = @transform_9, window_bounds = array<i64: 2, 16, 256>}]} {
    %cst = arith.constant 0.000000e+00 : f32
    %0 = vector.broadcast %cst : f32 to vector<1x256xf32>
    %c0 = arith.constant 0 : index
    %c0_0 = arith.constant 0 : index
    %c0_1 = arith.constant 0 : index
    %1 = vector.load %arg1[%c0, %c0_0, %c0_1] : memref<2x16x256xf32, #tpu.memory_space<vmem>>, vector<2x16x256xf32>
    %2 = vector.shape_cast %1 : vector<2x16x256xf32> to vector<32x256xf32>
    %c0_2 = arith.constant 0 : index
    %c256 = arith.constant 256 : index
    %3 = vector.load %arg11[%c0_2, %c256] : memref<32x768xf32, #tpu.memory_space<vmem>>, vector<32x256xf32>
    tpu.vector_store %arg11[%c0_2, %c256], %2 {strides = array<i32>} : memref<32x768xf32, #tpu.memory_space<vmem>>, vector<32x256xf32>,
    %c0_3 = arith.constant 0 : index
    %c0_4 = arith.constant 0 : index
    %4 = vector.load %arg11[%c0_3, %c0_4] : memref<32x768xf32, #tpu.memory_space<vmem>>, vector<1x256xf32>
    tpu.vector_store %arg11[%c0_3, %c0_4], %0 {strides = array<i32>} : memref<32x768xf32, #tpu.memory_space<vmem>>, vector<1x256xf32>,
    %5 = vector.extract_strided_slice %2 {offsets = [0, 0], sizes = [15, 256], strides = [1, 1]} : vector<32x256xf32> to vector<15x256xf32>
    %c1 = arith.constant 1 : index
    %c0_5 = arith.constant 0 : index
    %6 = vector.load %arg11[%c1, %c0_5] : memref<32x768xf32, #tpu.memory_space<vmem>>, vector<15x256xf32>
    tpu.vector_store %arg11[%c1, %c0_5], %5 {strides = array<i32>} : memref<32x768xf32, #tpu.memory_space<vmem>>, vector<15x256xf32>,
    %7 = vector.extract_strided_slice %2 {offsets = [1, 0], sizes = [15, 256], strides = [1, 1]} : vector<32x256xf32> to vector<15x256xf32>
    %c0_6 = arith.constant 0 : index
    %c512 = arith.constant 512 : index
    %8 = vector.load %arg11[%c0_6, %c512] : memref<32x768xf32, #tpu.memory_space<vmem>>, vector<15x256xf32>
    tpu.vector_store %arg11[%c0_6, %c512], %7 {strides = array<i32>} : memref<32x768xf32, #tpu.memory_space<vmem>>, vector<15x256xf32>,
    %c15 = arith.constant 15 : index
    %c512_7 = arith.constant 512 : index
    %9 = vector.load %arg11[%c15, %c512_7] : memref<32x768xf32, #tpu.memory_space<vmem>>, vector<1x256xf32>
    tpu.vector_store %arg11[%c15, %c512_7], %0 {strides = array<i32>} : memref<32x768xf32, #tpu.memory_space<vmem>>, vector<1x256xf32>,
    %c16 = arith.constant 16 : index
    %c0_8 = arith.constant 0 : index
    %10 = vector.load %arg11[%c16, %c0_8] : memref<32x768xf32, #tpu.memory_space<vmem>>, vector<1x256xf32>
    tpu.vector_store %arg11[%c16, %c0_8], %0 {strides = array<i32>} : memref<32x768xf32, #tpu.memory_space<vmem>>, vector<1x256xf32>,
    %11 = vector.extract_strided_slice %2 {offsets = [16, 0], sizes = [15, 256], strides = [1, 1]} : vector<32x256xf32> to vector<15x256xf32>
    %c17 = arith.constant 17 : index
    %c0_9 = arith.constant 0 : index
    %12 = vector.load %arg11[%c17, %c0_9] : memref<32x768xf32, #tpu.memory_space<vmem>>, vector<15x256xf32>
    tpu.vector_store %arg11[%c17, %c0_9], %11 {strides = array<i32>} : memref<32x768xf32, #tpu.memory_space<vmem>>, vector<15x256xf32>,
    %13 = vector.extract_strided_slice %2 {offsets = [17, 0], sizes = [15, 256], strides = [1, 1]} : vector<32x256xf32> to vector<15x256xf32>
    %c16_10 = arith.constant 16 : index
    %c512_11 = arith.constant 512 : index
    %14 = vector.load %arg11[%c16_10, %c512_11] : memref<32x768xf32, #tpu.memory_space<vmem>>, vector<15x256xf32>
    tpu.vector_store %arg11[%c16_10, %c512_11], %13 {strides = array<i32>} : memref<32x768xf32, #tpu.memory_space<vmem>>, vector<15x256xf32>,
    %c31 = arith.constant 31 : index
    %c512_12 = arith.constant 512 : index
    %15 = vector.load %arg11[%c31, %c512_12] : memref<32x768xf32, #tpu.memory_space<vmem>>, vector<1x256xf32>
    tpu.vector_store %arg11[%c31, %c512_12], %0 {strides = array<i32>} : memref<32x768xf32, #tpu.memory_space<vmem>>, vector<1x256xf32>,
    %c0_13 = arith.constant 0 : index
    %c0_14 = arith.constant 0 : index
    %16 = vector.load %arg11[%c0_13, %c0_14] : memref<32x768xf32, #tpu.memory_space<vmem>>, vector<32x768xf32>
    %c0_15 = arith.constant 0 : index
    %c0_16 = arith.constant 0 : index
    %17 = vector.load %arg2[%c0_15, %c0_16] : memref<768x256xf32, #tpu.memory_space<vmem>>, vector<768x256xf32>
    %cst_17 = arith.constant dense<0.000000e+00> : vector<32x256xf32>
    %18 = tpu.matmul %16, %17, %cst_17 {dimension_numbers = #tpu.dot_dimension_numbers<[1], [0], [0], [1], [0, 0, 1, 1], [], []>} : vector<32x768xf32>, vector<768x256xf32>, vector<32x256xf32> -> vector<32x256xf32>
    %c0_18 = arith.constant 0 : index
    %c0_19 = arith.constant 0 : index
    %19 = vector.load %arg3[%c0_18, %c0_19] : memref<1x256xf32, #tpu.memory_space<vmem>>, vector<1x256xf32>
    %20 = vector.broadcast %19 : vector<1x256xf32> to vector<32x256xf32>
    %21 = arith.addf %18, %20 : vector<32x256xf32>
    %cst_20 = arith.constant 0.000000e+00 : f32
    %22 = vector.broadcast %cst_20 : f32 to vector<32x256xf32>
    %23 = arith.maximumf %21, %22 : vector<32x256xf32>
    %c0_21 = arith.constant 0 : index
    %c256_22 = arith.constant 256 : index
    %24 = vector.load %arg11[%c0_21, %c256_22] : memref<32x768xf32, #tpu.memory_space<vmem>>, vector<32x256xf32>
    tpu.vector_store %arg11[%c0_21, %c256_22], %23 {strides = array<i32>} : memref<32x768xf32, #tpu.memory_space<vmem>>, vector<32x256xf32>,
    %c0_23 = arith.constant 0 : index
    %c0_24 = arith.constant 0 : index
    %25 = vector.load %arg11[%c0_23, %c0_24] : memref<32x768xf32, #tpu.memory_space<vmem>>, vector<1x256xf32>
    tpu.vector_store %arg11[%c0_23, %c0_24], %0 {strides = array<i32>} : memref<32x768xf32, #tpu.memory_space<vmem>>, vector<1x256xf32>,
    %26 = vector.extract_strided_slice %23 {offsets = [0, 0], sizes = [15, 256], strides = [1, 1]} : vector<32x256xf32> to vector<15x256xf32>
    %c1_25 = arith.constant 1 : index
    %c0_26 = arith.constant 0 : index
    %27 = vector.load %arg11[%c1_25, %c0_26] : memref<32x768xf32, #tpu.memory_space<vmem>>, vector<15x256xf32>
    tpu.vector_store %arg11[%c1_25, %c0_26], %26 {strides = array<i32>} : memref<32x768xf32, #tpu.memory_space<vmem>>, vector<15x256xf32>,
    %28 = vector.extract_strided_slice %23 {offsets = [1, 0], sizes = [15, 256], strides = [1, 1]} : vector<32x256xf32> to vector<15x256xf32>
    %c0_27 = arith.constant 0 : index
    %c512_28 = arith.constant 512 : index
    %29 = vector.load %arg11[%c0_27, %c512_28] : memref<32x768xf32, #tpu.memory_space<vmem>>, vector<15x256xf32>
    tpu.vector_store %arg11[%c0_27, %c512_28], %28 {strides = array<i32>} : memref<32x768xf32, #tpu.memory_space<vmem>>, vector<15x256xf32>,
    %c15_29 = arith.constant 15 : index
    %c512_30 = arith.constant 512 : index
    %30 = vector.load %arg11[%c15_29, %c512_30] : memref<32x768xf32, #tpu.memory_space<vmem>>, vector<1x256xf32>
    tpu.vector_store %arg11[%c15_29, %c512_30], %0 {strides = array<i32>} : memref<32x768xf32, #tpu.memory_space<vmem>>, vector<1x256xf32>,
    %c16_31 = arith.constant 16 : index
    %c0_32 = arith.constant 0 : index
    %31 = vector.load %arg11[%c16_31, %c0_32] : memref<32x768xf32, #tpu.memory_space<vmem>>, vector<1x256xf32>
    tpu.vector_store %arg11[%c16_31, %c0_32], %0 {strides = array<i32>} : memref<32x768xf32, #tpu.memory_space<vmem>>, vector<1x256xf32>,
    %32 = vector.extract_strided_slice %23 {offsets = [16, 0], sizes = [15, 256], strides = [1, 1]} : vector<32x256xf32> to vector<15x256xf32>
    %c17_33 = arith.constant 17 : index
    %c0_34 = arith.constant 0 : index
    %33 = vector.load %arg11[%c17_33, %c0_34] : memref<32x768xf32, #tpu.memory_space<vmem>>, vector<15x256xf32>
    tpu.vector_store %arg11[%c17_33, %c0_34], %32 {strides = array<i32>} : memref<32x768xf32, #tpu.memory_space<vmem>>, vector<15x256xf32>,
    %34 = vector.extract_strided_slice %23 {offsets = [17, 0], sizes = [15, 256], strides = [1, 1]} : vector<32x256xf32> to vector<15x256xf32>
    %c16_35 = arith.constant 16 : index
    %c512_36 = arith.constant 512 : index
    %35 = vector.load %arg11[%c16_35, %c512_36] : memref<32x768xf32, #tpu.memory_space<vmem>>, vector<15x256xf32>
    tpu.vector_store %arg11[%c16_35, %c512_36], %34 {strides = array<i32>} : memref<32x768xf32, #tpu.memory_space<vmem>>, vector<15x256xf32>,
    %c31_37 = arith.constant 31 : index
    %c512_38 = arith.constant 512 : index
    %36 = vector.load %arg11[%c31_37, %c512_38] : memref<32x768xf32, #tpu.memory_space<vmem>>, vector<1x256xf32>
    tpu.vector_store %arg11[%c31_37, %c512_38], %0 {strides = array<i32>} : memref<32x768xf32, #tpu.memory_space<vmem>>, vector<1x256xf32>,
    %c0_39 = arith.constant 0 : index
    %c0_40 = arith.constant 0 : index
    %37 = vector.load %arg11[%c0_39, %c0_40] : memref<32x768xf32, #tpu.memory_space<vmem>>, vector<32x768xf32>
    %c0_41 = arith.constant 0 : index
    %c0_42 = arith.constant 0 : index
    %38 = vector.load %arg4[%c0_41, %c0_42] : memref<768x256xf32, #tpu.memory_space<vmem>>, vector<768x256xf32>
    %cst_43 = arith.constant dense<0.000000e+00> : vector<32x256xf32>
    %39 = tpu.matmul %37, %38, %cst_43 {dimension_numbers = #tpu.dot_dimension_numbers<[1], [0], [0], [1], [0, 0, 1, 1], [], []>} : vector<32x768xf32>, vector<768x256xf32>, vector<32x256xf32> -> vector<32x256xf32>
    %c0_44 = arith.constant 0 : index
    %c0_45 = arith.constant 0 : index
    %40 = vector.load %arg5[%c0_44, %c0_45] : memref<1x256xf32, #tpu.memory_space<vmem>>, vector<1x256xf32>
    %41 = vector.broadcast %40 : vector<1x256xf32> to vector<32x256xf32>
    %42 = arith.addf %39, %41 : vector<32x256xf32>
    %43 = vector.shape_cast %42 : vector<32x256xf32> to vector<2x16x256xf32>
    %cst_46 = arith.constant dense<0.000000e+00> : vector<2x256xf32>
    %44 = vector.multi_reduction <add>, %43, %cst_46 [1] : vector<2x16x256xf32> to vector<2x256xf32>
    %cst_47 = arith.constant 1.600000e+01 : f32
    %45 = vector.broadcast %cst_47 : f32 to vector<2x256xf32>
    %46 = arith.divf %44, %45 : vector<2x256xf32>
    %c0_48 = arith.constant 0 : index
    %c0_49 = arith.constant 0 : index
    %47 = vector.load %arg6[%c0_48, %c0_49] : memref<256x128xf32, #tpu.memory_space<vmem>>, vector<256x128xf32>
    %cst_50 = arith.constant dense<0.000000e+00> : vector<2x128xf32>
    %48 = tpu.matmul %46, %47, %cst_50 {dimension_numbers = #tpu.dot_dimension_numbers<[1], [0], [0], [1], [0, 0, 1, 1], [], []>} : vector<2x256xf32>, vector<256x128xf32>, vector<2x128xf32> -> vector<2x128xf32>
    %c0_51 = arith.constant 0 : index
    %c0_52 = arith.constant 0 : index
    %49 = vector.load %arg7[%c0_51, %c0_52] : memref<1x128xf32, #tpu.memory_space<vmem>>, vector<1x128xf32>
    %50 = vector.broadcast %49 : vector<1x128xf32> to vector<2x128xf32>
    %51 = arith.addf %48, %50 : vector<2x128xf32>
    %cst_53 = arith.constant 0.000000e+00 : f32
    %52 = vector.broadcast %cst_53 : f32 to vector<2x128xf32>
    %53 = arith.maximumf %51, %52 : vector<2x128xf32>
    %c0_54 = arith.constant 0 : index
    %c0_55 = arith.constant 0 : index
    %54 = vector.load %arg8[%c0_54, %c0_55] : memref<128x256xf32, #tpu.memory_space<vmem>>, vector<128x256xf32>
    %cst_56 = arith.constant dense<0.000000e+00> : vector<2x256xf32>
    %55 = tpu.matmul %53, %54, %cst_56 {dimension_numbers = #tpu.dot_dimension_numbers<[1], [0], [0], [1], [0, 0, 1, 1], [], []>} : vector<2x128xf32>, vector<128x256xf32>, vector<2x256xf32> -> vector<2x256xf32>
    %c0_57 = arith.constant 0 : index
    %c0_58 = arith.constant 0 : index
    %56 = vector.load %arg9[%c0_57, %c0_58] : memref<1x256xf32, #tpu.memory_space<vmem>>, vector<1x256xf32>
    %57 = vector.broadcast %56 : vector<1x256xf32> to vector<2x256xf32>
    %58 = arith.addf %55, %57 : vector<2x256xf32>
    %59 = arith.negf %58 : vector<2x256xf32>
    %60 = math.exp %59 : vector<2x256xf32>
    %cst_59 = arith.constant 1.000000e+00 : f32
    %61 = vector.broadcast %cst_59 : f32 to vector<2x256xf32>
    %62 = arith.addf %61, %60 : vector<2x256xf32>
    %63 = arith.divf %61, %62 : vector<2x256xf32>
    %64 = vector.shape_cast %63 : vector<2x256xf32> to vector<2x1x256xf32>
    %65 = vector.broadcast %64 : vector<2x1x256xf32> to vector<2x16x256xf32>
    %66 = arith.mulf %43, %65 : vector<2x16x256xf32>
    %67 = arith.addf %66, %1 : vector<2x16x256xf32>
    %c0_60 = arith.constant 0 : index
    %c0_61 = arith.constant 0 : index
    %c0_62 = arith.constant 0 : index
    %68 = vector.load %arg10[%c0_60, %c0_61, %c0_62] : memref<2x16x256xf32, #tpu.memory_space<vmem>>, vector<2x16x256xf32>
    tpu.vector_store %arg10[%c0_60, %c0_61, %c0_62], %67 {strides = array<i32>} : memref<2x16x256xf32, #tpu.memory_space<vmem>>, vector<2x16x256xf32>,
    return
  }
  func.func @transform_0(%arg0: i32) -> (i32, i32, i32) {
    %c0_i32 = arith.constant 0 : i32
    %c0_i32_0 = arith.constant 0 : i32
    %c0_i32_1 = arith.constant 0 : i32
    return %arg0, %c0_i32, %c0_i32_0 : i32, i32, i32
  }
  func.func @transform_1(%arg0: i32) -> (i32, i32) {
    %c0_i32 = arith.constant 0 : i32
    %c0_i32_0 = arith.constant 0 : i32
    %c0_i32_1 = arith.constant 0 : i32
    return %c0_i32, %c0_i32_0 : i32, i32
  }
  func.func @transform_2(%arg0: i32) -> (i32, i32) {
    %c0_i32 = arith.constant 0 : i32
    %c0_i32_0 = arith.constant 0 : i32
    %c0_i32_1 = arith.constant 0 : i32
    return %c0_i32, %c0_i32_0 : i32, i32
  }
  func.func @transform_3(%arg0: i32) -> (i32, i32) {
    %c0_i32 = arith.constant 0 : i32
    %c0_i32_0 = arith.constant 0 : i32
    %c0_i32_1 = arith.constant 0 : i32
    return %c0_i32, %c0_i32_0 : i32, i32
  }
  func.func @transform_4(%arg0: i32) -> (i32, i32) {
    %c0_i32 = arith.constant 0 : i32
    %c0_i32_0 = arith.constant 0 : i32
    %c0_i32_1 = arith.constant 0 : i32
    return %c0_i32, %c0_i32_0 : i32, i32
  }
  func.func @transform_5(%arg0: i32) -> (i32, i32) {
    %c0_i32 = arith.constant 0 : i32
    %c0_i32_0 = arith.constant 0 : i32
    %c0_i32_1 = arith.constant 0 : i32
    return %c0_i32, %c0_i32_0 : i32, i32
  }
  func.func @transform_6(%arg0: i32) -> (i32, i32) {
    %c0_i32 = arith.constant 0 : i32
    %c0_i32_0 = arith.constant 0 : i32
    %c0_i32_1 = arith.constant 0 : i32
    return %c0_i32, %c0_i32_0 : i32, i32
  }
  func.func @transform_7(%arg0: i32) -> (i32, i32) {
    %c0_i32 = arith.constant 0 : i32
    %c0_i32_0 = arith.constant 0 : i32
    %c0_i32_1 = arith.constant 0 : i32
    return %c0_i32, %c0_i32_0 : i32, i32
  }
  func.func @transform_8(%arg0: i32) -> (i32, i32) {
    %c0_i32 = arith.constant 0 : i32
    %c0_i32_0 = arith.constant 0 : i32
    %c0_i32_1 = arith.constant 0 : i32
    return %c0_i32, %c0_i32_0 : i32, i32
  }
  func.func @transform_9(%arg0: i32) -> (i32, i32, i32) {
    %c0_i32 = arith.constant 0 : i32
    %c0_i32_0 = arith.constant 0 : i32
    %c0_i32_1 = arith.constant 0 : i32
    return %arg0, %c0_i32, %c0_i32_0 : i32, i32, i32
  }
}

</mosaic_0001>

<bundles_post_ra>
// kernel: tpu_custom_call.1
= control target key start
LH: loop header
LB: loop body
LE: loop exit
PB: predicated region body
PF: predicated region fallthrough
CT: control target
= control target key end

     0   :  { %14 = vsyncpa [#allocation4], 0  ;;  %s2130_s0 = inlined_call_operand.hbm [shape: f32[2,16,256], index: 0, kind: input, shape index: {}]   ;;  %s2131_s1 = inlined_call_operand.hbm [shape: f32[768,256], index: 1, kind: input, shape index: {}]   ;;  %s2132_s2 = inlined_call_operand.vmem [shape: f32[1,256], index: 2, kind: input, shape index: {}]   ;;  %s2133_s3 = inlined_call_operand.hbm [shape: f32[768,256], index: 3, kind: input, shape index: {}]   ;;  %s2134_s4 = inlined_call_operand.vmem [shape: f32[1,256], index: 4, kind: input, shape index: {}]   ;;  %s2135_s5 = inlined_call_operand.hbm [shape: f32[256,128], index: 5, kind: input, shape index: {}]   ;;  %s2136_s6 = inlined_call_operand.vmem [shape: f32[1,128], index: 6, kind: input, shape index: {}]   ;;  %s2137_s7 = inlined_call_operand.hbm [shape: f32[128,256], index: 7, kind: input, shape index: {}]   ;;  %s2138_s8 = inlined_call_operand.vmem [shape: f32[1,256], index: 8, kind: input, shape index: {}]   ;;  %s2139_s9 = inlined_call_operand.hbm [shape: f32[2,16,256], index: 9, kind: output, shape index: {}]  }
   0x1   :  { %15 = vsyncpa [#allocation7], 0 }
   0x2   :  { %16 = vsyncpa [#allocation10], 0 }
   0x3   :  { %17 = vsyncpa [#allocation5], 0  ;;  %s1837_s30 = smov [#allocation6]   ;;  %s1838_s11 = smov [#allocation9]  }
   0x4   :  { %s35_s10 = sshll.u32 %s1837_s30, 4  ;;  %s63_s12 = sshll.u32 %s1838_s11, 4  ;;  %s36_s10 = int_to_ptr.vmem [resolvable:$true] %s35_s10  ;;  %s64_s12 = int_to_ptr.vmem [resolvable:$true] %s63_s12 }
   0x5   :  { %s1717_s13 = scalar_lea.vmem %s36_s10, 24576  ;;  %p1722_p1 = scmp.lt.s32.totalorder %s36_s10, %s36_s10 }
   0x6   :  { %p1718_p0 = scmp.ne.s32.totalorder %s36_s10, %s1717_s13  ;;  %p1723_p2 = scmp.lt.s32.totalorder %s1717_s13, %s1717_s13 }
   0x8   :  { %p1724_p3 = por %p1723_p2, %p1722_p1 }
   0xa   :  { %p1725_p4 = pnand %p1724_p3, %p1718_p0 }
   0xc   :  { %1728 = shalt.err (!%p1725_p4)
}
   0xd   :  { %s1839_s14 = smov 256   ;;  %s1840_s15 = smov 16  }
   0xe   :  { %41 = dma.hbm_to_vmem [thread:$0]  %s2131_s1, 24576, %s36_s10, [#allocation7], %s1839_s14, %s1839_s14, %s1840_s15  }
   0xf   :  { %s1737_s18 = scalar_lea.vmem %s64_s12, 4096  ;;  %p1742_p6 = scmp.lt.s32.totalorder %s64_s12, %s64_s12 }
  0x10   :  { %p1738_p5 = scmp.ne.s32.totalorder %s64_s12, %s1737_s18  ;;  %p1743_p7 = scmp.lt.s32.totalorder %s1737_s18, %s1737_s18 }
  0x12   :  { %p1744_p8 = por %p1743_p7, %p1742_p6 }
  0x14   :  { %p1745_p9 = pnand %p1744_p8, %p1738_p5 }
  0x16   :  { %1748 = shalt.err (!%p1745_p9)
}
  0x17   :  { %s1841_s19 = smov 128   ;;  %s1842_s20 = smov 8  }
  0x18   :  { %69 = dma.hbm_to_vmem [thread:$0]  %s2135_s5, 4096, %s64_s12, [#allocation10], %s1841_s19, %s1841_s19, %s1842_s20  }
  0x19   :  { %s1843_s23 = smov [#allocation3]   ;;  %s1844_s25 = smov [#allocation8]  }
  0x1a   :  { %s23_s24 = sshll.u32 %s1843_s23, 4  ;;  %s49_s26 = sshll.u32 %s1844_s25, 4  ;;  %s24_s24 = int_to_ptr.vmem [resolvable:$true] %s23_s24  ;;  %s50_s26 = int_to_ptr.vmem [resolvable:$true] %s49_s26 }
  0x1b   :  { %s1757_s1 = scalar_lea.vmem %s24_s24, 1024  ;;  %p1762_p11 = scmp.lt.s32.totalorder %s24_s24, %s24_s24 }
  0x1c   :  { %p1758_p10 = scmp.ne.s32.totalorder %s24_s24, %s1757_s1  ;;  %p1763_p12 = scmp.lt.s32.totalorder %s1757_s1, %s1757_s1 }
  0x1e   :  { %p1764_p13 = por %p1763_p12, %p1762_p11 }
  0x20   :  { %p1765_p0 = pnand %p1764_p13, %p1758_p10 }
  0x22   :  { %1768 = shalt.err (!%p1765_p0)
}
  0x23   :  { %29 = dma.hbm_to_vmem [thread:$0]  %s2130_s0, 1024, %s24_s24, [#allocation4], %s1839_s14, %s1839_s14, %s1840_s15  }
  0x24   :  { %s1777_s5 = scalar_lea.vmem %s50_s26, 24576  ;;  %p1782_p2 = scmp.lt.s32.totalorder %s50_s26, %s50_s26 }
  0x25   :  { %p1778_p1 = scmp.ne.s32.totalorder %s50_s26, %s1777_s5  ;;  %p1783_p3 = scmp.lt.s32.totalorder %s1777_s5, %s1777_s5 }
  0x27   :  { %p1784_p4 = por %p1783_p3, %p1782_p2 }
  0x29   :  { %p1785_p5 = pnand %p1784_p4, %p1778_p1 }
  0x2b   :  { %1788 = shalt.err (!%p1785_p5)
}
  0x2c   :  { %55 = dma.hbm_to_vmem [thread:$0]  %s2133_s3, 24576, %s50_s26, [#allocation7], %s1839_s14, %s1839_s14, %s1840_s15  }
  0x2d   :  { %s1845_s10 = smov [#allocation11]  }
  0x2e   :  { %s77_s11 = sshll.u32 %s1845_s10, 4  ;;  %s78_s11 = int_to_ptr.vmem [resolvable:$true] %s77_s11 }
  0x2f   :  { %s1797_s12 = scalar_lea.vmem %s78_s11, 4096  ;;  %p1802_p7 = scmp.lt.s32.totalorder %s78_s11, %s78_s11 }
  0x30   :  { %p1798_p6 = scmp.ne.s32.totalorder %s78_s11, %s1797_s12  ;;  %p1803_p8 = scmp.lt.s32.totalorder %s1797_s12, %s1797_s12 }
  0x32   :  { %p1804_p9 = por %p1803_p8, %p1802_p7 }
  0x34   :  { %p1805_p10 = pnand %p1804_p9, %p1798_p6 }
  0x36   :  { %1808 = shalt.err (!%p1805_p10)
}
  0x37   :  { %83 = dma.hbm_to_vmem [thread:$0]  %s2137_s7, 4096, %s78_s11, [#allocation10], %s1839_s14, %s1839_s14, %s1840_s15  }
  0x38   :  { %1829 = dma.done.wait [#allocation4], 1024  }
  0x39   :  { %1830 = vsyncadd [#allocation4], 4294966272 }
  0x3a   :  { %1831 = dma.done.wait [#allocation7], 49152  }
  0x3b   :  { %1832 = vsyncadd [#allocation7], 4294918144 }
  0x3c   :  { %1833 = dma.done.wait [#allocation10], 8192  }
  0x3d   :  { %1834 = vsyncadd [#allocation10], 4294959104  ;;  %v117_v0 = vlaneseq  ;;  %v1846_v2 = vmov 0.0   ;;  %v253_v3 = vld [vmem:[#allocation6 + $0xf8] sm:$0xff]  ;;  %v252_v4 = vld [vmem:[#allocation6 + $0xf0] sm:$0xff]  ;;  %vm127_vm1 = vcmask 1040384  }
  0x3e   :  { %v251_v5 = vld [vmem:[#allocation6 + $0xe8] sm:$0xff]  ;;  %426 = vmatprep.subr.mxu0 %v253_v3  ;;  %v317_v6 = vld [vmem:[#allocation6 + $0x2f8] sm:$0xff]  ;;  %v250_v7 = vld [vmem:[#allocation6 + $0xe0] sm:$0xff]  ;;  %vm142_vm2 = vcmask 1046528   ;;  %vm1352_vm3 = vcmask 1041409  }
  0x3f   :  { %vm1927_vm0 = vcmp.lt.s32.totalorder %v117_v0, 256  ;;  %v316_v8 = vld [vmem:[#allocation6 + $0x2f0] sm:$0xff]  ;;  %427 = vmatpush1.msra.mxu0 %v252_v4  ;;  %515 = vmatprep.subr.mxu1 %v317_v6  ;;  %v249_v9 = vld [vmem:[#allocation6 + $0xd8] sm:$0xff]  ;;  %v315_v10 = vld [vmem:[#allocation6 + $0x2e8] sm:$0xff] }
  0x40   :  { %121 = vst.msk [vmem:[#allocation2] ss:$8 sm:$0x3] %vm1927_vm0, %v1846_v2  ;;  %158 = vst.msk [vmem:[#allocation2 + $0x57] ss:$8 sm:$0x3] %vm1927_vm0, %v1846_v2  ;;  %428 = vmatprep.subr.mxu0 %v251_v5  ;;  %516 = vmatpush1.msra.mxu1 %v316_v8 }
  0x41   :  { %161 = vst.msk [vmem:[#allocation2 + $0x60] ss:$8 sm:$0x3] %vm1927_vm0, %v1846_v2  ;;  %196 = vst.msk [vmem:[#allocation2 + $0xb7] ss:$8 sm:$0x3] %vm1927_vm0, %v1846_v2  ;;  %429 = vmatpush1.msra.mxu0 %v250_v7  ;;  %517 = vmatprep.subr.mxu1 %v315_v10 }
  0x42   :  { %v248_v11 = vld [vmem:[#allocation6 + $0xd0] sm:$0xff]  ;;  %v314_v12 = vld [vmem:[#allocation6 + $0x2e0] sm:$0xff]  ;;  %v313_v13 = vld [vmem:[#allocation6 + $0x2d8] sm:$0xff]  ;;  %430 = vmatprep.subr.mxu0 %v249_v9 }
  0x43   :  { %v247_v14 = vld [vmem:[#allocation6 + $0xc8] sm:$0xff]  ;;  %v312_v15 = vld [vmem:[#allocation6 + $0x2d0] sm:$0xff]  ;;  %518 = vmatpush1.msra.mxu1 %v314_v12  ;;  %v246_v16 = vld [vmem:[#allocation6 + $0xc0] sm:$0xff]  ;;  %431 = vmatpush1.msra.mxu0 %v248_v11 }
  0x44   :  { %v311_v17 = vld [vmem:[#allocation6 + $0x2c8] sm:$0xff]  ;;  %519 = vmatprep.subr.mxu1 %v313_v13  ;;  %v245_v18 = vld [vmem:[#allocation6 + $0xb8] sm:$0xff]  ;;  %v310_v19 = vld [vmem:[#allocation6 + $0x2c0] sm:$0xff]  ;;  %432 = vmatprep.subr.mxu0 %v247_v14 }
  0x45   :  { %520 = vmatpush1.msra.mxu1 %v312_v15  ;;  %v244_v20 = vld [vmem:[#allocation6 + $0xb0] sm:$0xff]  ;;  %v309_v21 = vld [vmem:[#allocation6 + $0x2b8] sm:$0xff]  ;;  %433 = vmatpush1.msra.mxu0 %v246_v16  ;;  %v243_v22 = vld [vmem:[#allocation6 + $0xa8] sm:$0xff] }
  0x46   :  { %521 = vmatprep.subr.mxu1 %v311_v17  ;;  %v308_v23 = vld [vmem:[#allocation6 + $0x2b0] sm:$0xff]  ;;  %434 = vmatprep.subr.mxu0 %v245_v18  ;;  %v242_v24 = vld [vmem:[#allocation6 + $0xa0] sm:$0xff]  ;;  %v307_v25 = vld [vmem:[#allocation6 + $0x2a8] sm:$0xff] }
  0x47   :  { %522 = vmatpush1.msra.mxu1 %v310_v19  ;;  %435 = vmatpush1.msra.mxu0 %v244_v20  ;;  %v241_v26 = vld [vmem:[#allocation6 + $0x98] sm:$0xff]  ;;  %v306_v27 = vld [vmem:[#allocation6 + $0x2a0] sm:$0xff]  ;;  %v240_v28 = vld [vmem:[#allocation6 + $0x90] sm:$0xff] }
  0x48   :  { %523 = vmatprep.subr.mxu1 %v309_v21  ;;  %436 = vmatprep.subr.mxu0 %v243_v22  ;;  %v305_v29 = vld [vmem:[#allocation6 + $0x298] sm:$0xff]  ;;  %v239_v30 = vld [vmem:[#allocation6 + $0x88] sm:$0xff]  ;;  %v304_v31 = vld [vmem:[#allocation6 + $0x290] sm:$0xff] }
  0x49   :  { %524 = vmatpush1.msra.mxu1 %v308_v23  ;;  %437 = vmatpush1.msra.mxu0 %v242_v24  ;;  %v238_v32 = vld [vmem:[#allocation6 + $0x80] sm:$0xff]  ;;  %v303_v33 = vld [vmem:[#allocation6 + $0x288] sm:$0xff]  ;;  %v237_v34 = vld [vmem:[#allocation6 + $0x78] sm:$0xff] }
  0x4a   :  { %525 = vmatprep.subr.mxu1 %v307_v25  ;;  %438 = vmatprep.subr.mxu0 %v241_v26  ;;  %v302_v35 = vld [vmem:[#allocation6 + $0x280] sm:$0xff]  ;;  %v236_v36 = vld [vmem:[#allocation6 + $0x70] sm:$0xff]  ;;  %v301_v37 = vld [vmem:[#allocation6 + $0x278] sm:$0xff] }
  0x4b   :  { %526 = vmatpush1.msra.mxu1 %v306_v27  ;;  %439 = vmatpush1.msra.mxu0 %v240_v28  ;;  %v235_v38 = vld [vmem:[#allocation6 + $0x68] sm:$0xff]  ;;  %v300_v39 = vld [vmem:[#allocation6 + $0x270] sm:$0xff]  ;;  %v234_v40 = vld [vmem:[#allocation6 + $0x60] sm:$0xff] }
  0x4c   :  { %527 = vmatprep.subr.mxu1 %v305_v29  ;;  %440 = vmatprep.subr.mxu0 %v239_v30  ;;  %v299_v41 = vld [vmem:[#allocation6 + $0x268] sm:$0xff]  ;;  %v233_v42 = vld [vmem:[#allocation6 + $0x58] sm:$0xff]  ;;  %v298_v43 = vld [vmem:[#allocation6 + $0x260] sm:$0xff] }
  0x4d   :  { %528 = vmatpush1.msra.mxu1 %v304_v31  ;;  %441 = vmatpush1.msra.mxu0 %v238_v32  ;;  %v232_v44 = vld [vmem:[#allocation6 + $0x50] sm:$0xff]  ;;  %v297_v45 = vld [vmem:[#allocation6 + $0x258] sm:$0xff]  ;;  %v231_v46 = vld [vmem:[#allocation6 + $0x48] sm:$0xff] }
  0x4e   :  { %529 = vmatprep.subr.mxu1 %v303_v33  ;;  %442 = vmatprep.subr.mxu0 %v237_v34  ;;  %v296_v47 = vld [vmem:[#allocation6 + $0x250] sm:$0xff]  ;;  %v230_v48 = vld [vmem:[#allocation6 + $0x40] sm:$0xff]  ;;  %v295_v49 = vld [vmem:[#allocation6 + $0x248] sm:$0xff] }
  0x4f   :  { %530 = vmatpush1.msra.mxu1 %v302_v35  ;;  %443 = vmatpush1.msra.mxu0 %v236_v36  ;;  %v229_v50 = vld [vmem:[#allocation6 + $0x38] sm:$0xff]  ;;  %v294_v51 = vld [vmem:[#allocation6 + $0x240] sm:$0xff]  ;;  %v228_v52 = vld [vmem:[#allocation6 + $0x30] sm:$0xff] }
  0x50   :  { %531 = vmatprep.subr.mxu1 %v301_v37  ;;  %444 = vmatprep.subr.mxu0 %v235_v38  ;;  %v293_v53 = vld [vmem:[#allocation6 + $0x238] sm:$0xff]  ;;  %v227_v54 = vld [vmem:[#allocation6 + $0x28] sm:$0xff]  ;;  %v292_v55 = vld [vmem:[#allocation6 + $0x230] sm:$0xff] }
  0x51   :  { %532 = vmatpush1.msra.mxu1 %v300_v39  ;;  %445 = vmatpush1.msra.mxu0 %v234_v40  ;;  %v226_v56 = vld [vmem:[#allocation6 + $0x20] sm:$0xff]  ;;  %v291_v57 = vld [vmem:[#allocation6 + $0x228] sm:$0xff]  ;;  %v225_v58 = vld [vmem:[#allocation6 + $0x18] sm:$0xff] }
  0x52   :  { %533 = vmatprep.subr.mxu1 %v299_v41  ;;  %446 = vmatprep.subr.mxu0 %v233_v42  ;;  %v290_v59 = vld [vmem:[#allocation6 + $0x220] sm:$0xff]  ;;  %v224_v60 = vld [vmem:[#allocation6 + $0x10] sm:$0xff]  ;;  %v289_v61 = vld [vmem:[#allocation6 + $0x218] sm:$0xff] }
  0x53   :  { %534 = vmatpush1.msra.mxu1 %v298_v43  ;;  %447 = vmatpush1.msra.mxu0 %v232_v44  ;;  %v223_v62 = vld [vmem:[#allocation6 + $0x8] sm:$0xff]  ;;  %v288_v63 = vld [vmem:[#allocation6 + $0x210] sm:$0xff]  ;;  %v222_v3 = vld [vmem:[#allocation6] sm:$0xff] }
  0x54   :  { %535 = vmatprep.subr.mxu1 %v297_v45  ;;  %448 = vmatprep.subr.mxu0 %v231_v46  ;;  %v287_v4 = vld [vmem:[#allocation6 + $0x208] sm:$0xff]  ;;  %v285_v5 = vld [vmem:[#allocation6 + $0x1f8] sm:$0xff]  ;;  %v286_v6 = vld [vmem:[#allocation6 + $0x200] sm:$0xff] }
  0x55   :  { %536 = vmatpush1.msra.mxu1 %v296_v47  ;;  %449 = vmatpush1.msra.mxu0 %v230_v48  ;;  %v284_v7 = vld [vmem:[#allocation6 + $0x1f0] sm:$0xff]  ;;  %v349_v8 = vld [vmem:[#allocation6 + $0x3f8] sm:$0xff]  ;;  %v283_v9 = vld [vmem:[#allocation6 + $0x1e8] sm:$0xff] }
  0x56   :  { %537 = vmatprep.subr.mxu1 %v295_v49  ;;  %450 = vmatprep.subr.mxu0 %v229_v50  ;;  %v348_v10 = vld [vmem:[#allocation6 + $0x3f0] sm:$0xff]  ;;  %v282_v11 = vld [vmem:[#allocation6 + $0x1e0] sm:$0xff]  ;;  %v347_v12 = vld [vmem:[#allocation6 + $0x3e8] sm:$0xff] }
  0x57   :  { %538 = vmatpush1.msra.mxu1 %v294_v51  ;;  %451 = vmatpush1.msra.mxu0 %v228_v52  ;;  %v281_v13 = vld [vmem:[#allocation6 + $0x1d8] sm:$0xff]  ;;  %v346_v14 = vld [vmem:[#allocation6 + $0x3e0] sm:$0xff]  ;;  %v280_v15 = vld [vmem:[#allocation6 + $0x1d0] sm:$0xff] }
  0x58   :  { %539 = vmatprep.subr.mxu1 %v293_v53  ;;  %452 = vmatprep.subr.mxu0 %v227_v54  ;;  %v345_v16 = vld [vmem:[#allocation6 + $0x3d8] sm:$0xff]  ;;  %v279_v17 = vld [vmem:[#allocation6 + $0x1c8] sm:$0xff]  ;;  %v344_v18 = vld [vmem:[#allocation6 + $0x3d0] sm:$0xff] }
  0x59   :  { %540 = vmatpush1.msra.mxu1 %v292_v55  ;;  %453 = vmatpush1.msra.mxu0 %v226_v56  ;;  %v278_v19 = vld [vmem:[#allocation6 + $0x1c0] sm:$0xff]  ;;  %v343_v20 = vld [vmem:[#allocation6 + $0x3c8] sm:$0xff]  ;;  %v277_v21 = vld [vmem:[#allocation6 + $0x1b8] sm:$0xff] }
  0x5a   :  { %541 = vmatprep.subr.mxu1 %v291_v57  ;;  %454 = vmatprep.subr.mxu0 %v225_v58  ;;  %v342_v22 = vld [vmem:[#allocation6 + $0x3c0] sm:$0xff]  ;;  %v276_v23 = vld [vmem:[#allocation6 + $0x1b0] sm:$0xff]  ;;  %v341_v24 = vld [vmem:[#allocation6 + $0x3b8] sm:$0xff] }
  0x5b   :  { %542 = vmatpush1.msra.mxu1 %v290_v59  ;;  %455 = vmatpush1.msra.mxu0 %v224_v60  ;;  %v275_v25 = vld [vmem:[#allocation6 + $0x1a8] sm:$0xff]  ;;  %v340_v26 = vld [vmem:[#allocation6 + $0x3b0] sm:$0xff]  ;;  %v274_v27 = vld [vmem:[#allocation6 + $0x1a0] sm:$0xff] }
  0x5c   :  { %543 = vmatprep.subr.mxu1 %v289_v61  ;;  %456 = vmatprep.subr.mxu0 %v223_v62  ;;  %v339_v28 = vld [vmem:[#allocation6 + $0x3a8] sm:$0xff]  ;;  %v273_v30 = vld [vmem:[#allocation6 + $0x198] sm:$0xff]  ;;  %v338_v31 = vld [vmem:[#allocation6 + $0x3a0] sm:$0xff] }
  0x5d   :  { %544 = vmatpush1.msra.mxu1 %v288_v63  ;;  %457 = vmatpush1.msra.mxu0 %v222_v3  ;;  %v1943_v29 = vld [vmem:[#allocation3 + $0x8] sm:$0xff]  ;;  %v1946_v33 = vld [vmem:[#allocation3] sm:$0xff]  ;;  %v272_v34 = vld [vmem:[#allocation6 + $0x190] sm:$0xff] }
  0x5e   :  { %545 = vmatprep.subr.mxu1 %v287_v4  ;;  %458 = vmatprep.subr.mxu0 %v285_v5  ;;  %v129_v32 = vrot.slane %v1943_v29, 7  ;;  %v337_v35 = vld [vmem:[#allocation6 + $0x398] sm:$0xff]  ;;  %v128_v36 = vrot.slane %v1946_v33, 7  ;;  %v271_v37 = vld [vmem:[#allocation6 + $0x188] sm:$0xff]  ;;  %v336_v38 = vld [vmem:[#allocation6 + $0x390] sm:$0xff] }
  0x5f   :  { %546 = vmatpush1.msra.mxu1 %v286_v6  ;;  %459 = vmatpush2.msra.mxu0 %v284_v7  ;;  %v270_v39 = vld [vmem:[#allocation6 + $0x180] sm:$0xff]  ;;  %v335_v40 = vld [vmem:[#allocation6 + $0x388] sm:$0xff]  ;;  %v269_v41 = vld [vmem:[#allocation6 + $0x178] sm:$0xff] }
  0x60   :  { %547 = vmatprep.subr.mxu1 %v349_v8  ;;  %460 = vmatprep.subr.mxu0 %v283_v9  ;;  %139 = vst [vmem:[#allocation2 + $0x8] sm:$0xfe] %v129_v32  ;;  %138 = vst [vmem:[#allocation2] sm:$0xfe] %v128_v36  ;;  %v334_v42 = vld [vmem:[#allocation6 + $0x380] sm:$0xff]  ;;  %v268_v43 = vld [vmem:[#allocation6 + $0x170] sm:$0xff] }
  0x61   :  { %548 = vmatpush2.msra.mxu1 %v348_v10  ;;  %461 = vmatpush2.msra.mxu0 %v282_v11  ;;  %v333_v44 = vld [vmem:[#allocation6 + $0x378] sm:$0xff]  ;;  %v267_v45 = vld [vmem:[#allocation6 + $0x168] sm:$0xff]  ;;  %v332_v46 = vld [vmem:[#allocation6 + $0x370] sm:$0xff] }
  0x62   :  { %549 = vmatprep.subr.mxu1 %v347_v12  ;;  %462 = vmatprep.subr.mxu0 %v281_v13  ;;  %v266_v47 = vld [vmem:[#allocation6 + $0x160] sm:$0xff]  ;;  %v331_v48 = vld [vmem:[#allocation6 + $0x368] sm:$0xff]  ;;  %v265_v49 = vld [vmem:[#allocation6 + $0x158] sm:$0xff] }
  0x63   :  { %550 = vmatpush2.msra.mxu1 %v346_v14  ;;  %463 = vmatpush2.msra.mxu0 %v280_v15  ;;  %v330_v50 = vld [vmem:[#allocation6 + $0x360] sm:$0xff]  ;;  %v264_v51 = vld [vmem:[#allocation6 + $0x150] sm:$0xff]  ;;  %v263_v52 = vld [vmem:[#allocation6 + $0x148] sm:$0xff] }
  0x64   :  { %551 = vmatprep.subr.mxu1 %v345_v16  ;;  %464 = vmatprep.subr.mxu0 %v279_v17  ;;  %v329_v53 = vld [vmem:[#allocation6 + $0x358] sm:$0xff]  ;;  %v328_v54 = vld [vmem:[#allocation6 + $0x350] sm:$0xff]  ;;  %v262_v57 = vld [vmem:[#allocation6 + $0x140] sm:$0xff] }
  0x65   :  { %552 = vmatpush2.msra.mxu1 %v344_v18  ;;  %465 = vmatpush2.msra.mxu0 %v278_v19  ;;  %v327_v58 = vld [vmem:[#allocation6 + $0x348] sm:$0xff]  ;;  %v261_v59 = vld [vmem:[#allocation6 + $0x138] sm:$0xff]  ;;  %v326_v60 = vld [vmem:[#allocation6 + $0x340] sm:$0xff] }
  0x66   :  { %553 = vmatprep.subr.mxu1 %v343_v20  ;;  %466 = vmatprep.subr.mxu0 %v277_v21  ;;  %v260_v61 = vld [vmem:[#allocation6 + $0x130] sm:$0xff]  ;;  %v325_v62 = vld [vmem:[#allocation6 + $0x338] sm:$0xff]  ;;  %v259_v63 = vld [vmem:[#allocation6 + $0x128] sm:$0xff] }
  0x67   :  { %554 = vmatpush2.msra.mxu1 %v342_v22  ;;  %467 = vmatpush2.msra.mxu0 %v276_v23  ;;  %v199_v55 = vld [vmem:[#allocation2 + $0x8] sm:$0xff]  ;;  %v198_v56 = vld [vmem:[#allocation2] sm:$0xff]  ;;  %v324_v3 = vld [vmem:[#allocation6 + $0x330] sm:$0xff] }
  0x68   :  { %555 = vmatprep.subr.mxu1 %v341_v24  ;;  %468 = vmatprep.subr.mxu0 %v275_v25  ;;  %709 = vst.msk [vmem:[#allocation2] ss:$8 sm:$0x3] %vm1927_vm0, %v1846_v2  ;;  %v258_v4 = vld [vmem:[#allocation6 + $0x120] sm:$0xff]  ;;  %v323_v5 = vld [vmem:[#allocation6 + $0x328] sm:$0xff]  ;;  %v257_v6 = vld [vmem:[#allocation6 + $0x118] sm:$0xff] }
  0x69   :  { %556 = vmatpush2.msra.mxu1 %v340_v26  ;;  %469 = vmatpush2.msra.mxu0 %v274_v27  ;;  %v322_v7 = vld [vmem:[#allocation6 + $0x320] sm:$0xff]  ;;  %v256_v8 = vld [vmem:[#allocation6 + $0x110] sm:$0xff]  ;;  %v321_v9 = vld [vmem:[#allocation6 + $0x318] sm:$0xff] }
  0x6a   :  { %557 = vmatprep.subr.mxu1 %v339_v28  ;;  %470 = vmatprep.subr.mxu0 %v273_v30  ;;  %v255_v10 = vld [vmem:[#allocation6 + $0x108] sm:$0xff]  ;;  %v1956_v11 = vld [vmem:[#allocation3 + $0x18] sm:$0xff]  ;;  %v254_v12 = vld [vmem:[#allocation6 + $0x100] sm:$0xff] }
  0x6b   :  { %558 = vmatpush2.msra.mxu1 %v338_v31  ;;  %471 = vmatpush2.msra.mxu0 %v272_v34  ;;  %v320_v13 = vld [vmem:[#allocation6 + $0x310] sm:$0xff]  ;;  %v147_v15 = vrot.slane %v1956_v11, 1  ;;  %v319_v16 = vld [vmem:[#allocation6 + $0x308] sm:$0xff]  ;;  %v132_v17 = vrot.slane %v1956_v11, 7  ;;  %v381_v20 = vld [vmem:[#allocation6 + $0x4f8] sm:$0xff] }
  0x6c   :  { %559 = vmatprep.subr.mxu1 %v337_v35  ;;  %472 = vmatprep.subr.mxu0 %v271_v37  ;;  %v1958_v14 = vld [vmem:[#allocation3 + $0x10] sm:$0xff]  ;;  %v1962_v18 = vld [vmem:[#allocation3 + $0x28] sm:$0xff]  ;;  %v318_v21 = vld [vmem:[#allocation6 + $0x300] sm:$0xff] }
  0x6d   :  { %560 = vmatpush2.msra.mxu1 %v336_v38  ;;  %473 = vmatpush2.msra.mxu0 %v270_v39  ;;  %v144_v19 = vrot.slane %v1958_v14, 1  ;;  %v130_v22 = vrot.slane %v1958_v14, 7  ;;  %v168_v23 = vrot.slane %v1962_v18, 7  ;;  %v1967_v24 = vld [vmem:[#allocation3 + $0x20] sm:$0xff]  ;;  %156 = vst [vmem:[#allocation2 + $0x58] sm:$0x7f] %v147_v15  ;;  %v133_v35 = vsel %vm127_vm1, %v129_v32, %v132_v17 }
  0x6e   :  { %561 = vmatprep.subr.mxu1 %v335_v40  ;;  %474 = vmatprep.subr.mxu0 %v269_v41  ;;  %v380_v25 = vld [vmem:[#allocation6 + $0x4f0] sm:$0xff]  ;;  %v167_v26 = vrot.slane %v1967_v24, 7  ;;  %v1972_v27 = vld [vmem:[#allocation3 + $0x38] sm:$0xff]  ;;  %v379_v28 = vld [vmem:[#allocation6 + $0x4e8] sm:$0xff] }
  0x6f   :  { %562 = vmatpush2.msra.mxu1 %v334_v42  ;;  %475 = vmatpush2.msra.mxu0 %v268_v43  ;;  %155 = vst [vmem:[#allocation2 + $0x50] sm:$0x7f] %v144_v19  ;;  %178 = vst [vmem:[#allocation2 + $0x68] sm:$0xfe] %v168_v23  ;;  %v1976_v30 = vld [vmem:[#allocation3 + $0x30] sm:$0xff]  ;;  %v185_v31 = vrot.slane %v1972_v27, 1  ;;  %v131_v39 = vsel %vm127_vm1, %v128_v36, %v130_v22 }
  0x70   :  { %563 = vmatprep.subr.mxu1 %v333_v44  ;;  %476 = vmatprep.subr.mxu0 %v267_v45  ;;  %v378_v34 = vld [vmem:[#allocation6 + $0x4e0] sm:$0xff]  ;;  %177 = vst [vmem:[#allocation2 + $0x60] sm:$0xfe] %v167_v26  ;;  %v182_v37 = vrot.slane %v1976_v30, 1  ;;  %v377_v38 = vld [vmem:[#allocation6 + $0x4d8] sm:$0xff]  ;;  %v376_v40 = vld [vmem:[#allocation6 + $0x4d0] sm:$0xff] }
  0x71   :  { %564 = vmatpush2.msra.mxu1 %v332_v46  ;;  %477 = vmatpush2.msra.mxu0 %v266_v47  ;;  %194 = vst [vmem:[#allocation2 + $0xb8] sm:$0x7f] %v185_v31  ;;  %v375_v32 = vld [vmem:[#allocation6 + $0x4c8] sm:$0xff]  ;;  %v374_v41 = vld [vmem:[#allocation6 + $0x4c0] sm:$0xff]  ;;  %v171_v42 = vrot.slane %v1972_v27, 7  ;;  %v373_v36 = vld [vmem:[#allocation6 + $0x4b8] sm:$0xff] }
  0x72   :  { %565 = vmatprep.subr.mxu1 %v331_v48  ;;  %478 = vmatprep.subr.mxu0 %v265_v49  ;;  %193 = vst [vmem:[#allocation2 + $0xb0] sm:$0x7f] %v182_v37  ;;  %v169_v43 = vrot.slane %v1976_v30, 7  ;;  %v372_v46 = vld [vmem:[#allocation6 + $0x4b0] sm:$0xff]  ;;  %v371_v48 = vld [vmem:[#allocation6 + $0x4a8] sm:$0xff] }
  0x73   :  { %566 = vmatpush2.msra.mxu1 %v330_v50  ;;  %479 = vmatpush2.msra.mxu0 %v264_v51  ;;  %v370_v50 = vld [vmem:[#allocation6 + $0x4a0] sm:$0xff]  ;;  %v172_v51 = vsel %vm127_vm1, %v168_v23, %v171_v42  ;;  %v363_v1 = vld [vmem:[#allocation6 + $0x468] sm:$0xff]  ;;  %v408_v22 = vld [vmem:[#allocation6 + $0x5d0] sm:$0xff] }
  0x74   :  { %567 = vmatprep.subr.mxu1 %v329_v53  ;;  %480 = vmatprep.subr.mxu0 %v263_v52  ;;  %v1995_v44 = vld [vmem:[#allocation2 + $0x58] sm:$0xff]  ;;  %v146_v52 = vrot.slane %v1943_v29, 1  ;;  %v411_v17 = vld [vmem:[#allocation6 + $0x5e8] sm:$0xff]  ;;  %v396_v42 = vld [vmem:[#allocation6 + $0x570] sm:$0xff] }
  0x75   :  { %568 = vmatpush2.msra.mxu1 %v328_v54  ;;  %481 = vmatpush2.msra.mxu0 %v262_v57  ;;  %v369_v53 = vld [vmem:[#allocation6 + $0x498] sm:$0xff]  ;;  %v170_v54 = vsel %vm127_vm1, %v167_v26, %v169_v43  ;;  %v368_v57 = vld [vmem:[#allocation6 + $0x490] sm:$0xff]  ;;  %v407_v23 = vld [vmem:[#allocation6 + $0x5c8] sm:$0xff] }
  0x76   :  { %569 = vmatprep.subr.mxu1 %v327_v58  ;;  %482 = vmatprep.subr.mxu0 %v261_v59  ;;  %v1997_v45 = vld [vmem:[#allocation2 + $0x50] sm:$0xff]  ;;  %v211_v47 = vld [vmem:[#allocation2 + $0x68] sm:$0xff]  ;;  %v366_v58 = vld [vmem:[#allocation6 + $0x480] sm:$0xff]  ;;  %v148_v59 = vsel %vm142_vm2, %v146_v52, %v147_v15 }
  0x77   :  { %570 = vmatpush2.msra.mxu1 %v326_v60  ;;  %483 = vmatpush2.msra.mxu0 %v260_v61  ;;  %743 = vst.msk [vmem:[#allocation2 + $0x57] ss:$8 sm:$0x3] %vm1927_vm0, %v1846_v2  ;;  %v210_v49 = vld [vmem:[#allocation2 + $0x60] sm:$0xff]  ;;  %v365_v60 = vld [vmem:[#allocation6 + $0x478] sm:$0xff]  ;;  %v364_v61 = vld [vmem:[#allocation6 + $0x470] sm:$0xff] }
  0x78   :  { %571 = vmatprep.subr.mxu1 %v325_v62  ;;  %484 = vmatprep.subr.mxu0 %v259_v63  ;;  %745 = vst.msk [vmem:[#allocation2 + $0x60] ss:$8 sm:$0x3] %vm1927_vm0, %v1846_v2  ;;  %v362_v62 = vld [vmem:[#allocation6 + $0x460] sm:$0xff]  ;;  %v361_v63 = vld [vmem:[#allocation6 + $0x458] sm:$0xff]  ;;  %v387_v52 = vld [vmem:[#allocation6 + $0x528] sm:$0xff] }
  0x79   :  { %572 = vmatpush2.msra.mxu1 %v324_v3  ;;  %485 = vmatpush2.msra.mxu0 %v258_v4  ;;  %v360_v3 = vld [vmem:[#allocation6 + $0x450] sm:$0xff]  ;;  %v359_v4 = vld [vmem:[#allocation6 + $0x448] sm:$0xff]  ;;  %v413_v15 = vld [vmem:[#allocation6 + $0x5f8] sm:$0xff] }
  0x7a   :  { %573 = vmatprep.subr.mxu1 %v323_v5  ;;  %486 = vmatprep.subr.mxu0 %v257_v6  ;;  %v358_v5 = vld [vmem:[#allocation6 + $0x440] sm:$0xff]  ;;  %v357_v6 = vld [vmem:[#allocation6 + $0x438] sm:$0xff] }
  0x7b   :  { %574 = vmatpush2.msra.mxu1 %v322_v7  ;;  %487 = vmatpush2.msra.mxu0 %v256_v8  ;;  %v356_v7 = vld [vmem:[#allocation6 + $0x430] sm:$0xff]  ;;  %v355_v8 = vld [vmem:[#allocation6 + $0x428] sm:$0xff]  ;;  %v405_v26 = vld [vmem:[#allocation6 + $0x5b8] sm:$0xff] }
  0x7c   :  { %575 = vmatprep.subr.mxu1 %v321_v9  ;;  %488 = vmatprep.subr.mxu0 %v255_v10  ;;  %v354_v9 = vld [vmem:[#allocation6 + $0x420] sm:$0xff]  ;;  %v353_v10 = vld [vmem:[#allocation6 + $0x418] sm:$0xff] }
  0x7d   :  { %490 = vmatprep.mubr.f32.mxu0 %v199_v55  ;;  %489 = vmatpush2.msra.mxu0 %v254_v12  ;;  %v2010_v55 = vld [vmem:[#allocation2 + $0xb8] sm:$0xff]  ;;  %v351_v12 = vld [vmem:[#allocation6 + $0x408] sm:$0xff]  ;;  %v394_v43 = vld [vmem:[#allocation6 + $0x560] sm:$0xff] }
  0x7e   :  { %576 = vmatpush2.msra.mxu1 %v320_v13  ;;  %491 = vmatmul.mubr.f32.vlgmr.msra.gmra.mxu0 %v198_v56  ;;  %v2012_v56 = vld [vmem:[#allocation2 + $0xb0] sm:$0xff]  ;;  %v350_v13 = vld [vmem:[#allocation6 + $0x400] sm:$0xff] }
  0x7f   :  { %577 = vmatprep.subr.mxu1 %v319_v16  ;;  %604 = vmatprep.subr.mxu0 %v381_v20  ;;  %779 = vst.msk [vmem:[#allocation2 + $0xb7] ss:$8 sm:$0x3] %vm1927_vm0, %v1846_v2  ;;  %v412_v16 = vld [vmem:[#allocation6 + $0x5f0] sm:$0xff]  ;;  %v410_v20 = vld [vmem:[#allocation6 + $0x5e0] sm:$0xff] }
  0x80   :  { %578 = vmatpush2.msra.mxu1 %v318_v21  ;;  %579 = vmatprep.mubr.f32.mxu1 %v1943_v29  ;;  %v367_v29 = vld [vmem:[#allocation6 + $0x488] sm:$0xff]  ;;  %v409_v21 = vld [vmem:[#allocation6 + $0x5d8] sm:$0xff] }
  0x81   :  { %605 = vmatpush1.msra.mxu0 %v380_v25  ;;  %580 = vmatmul.mubr.f32.vlgmr.msra.gmra.mxu1 %v1946_v33  ;;  %v406_v25 = vld [vmem:[#allocation6 + $0x5c0] sm:$0xff] }
  0x82   :  { %606 = vmatprep.subr.mxu0 %v379_v28  ;;  %496 = vmatprep.mubr.f32.mxu0 %v133_v35  ;;  %v404_v28 = vld [vmem:[#allocation6 + $0x5b0] sm:$0xff]  ;;  %v402_v35 = vld [vmem:[#allocation6 + $0x5a0] sm:$0xff] }
  0x83   :  { %607 = vmatpush1.msra.mxu0 %v378_v34  ;;  %585 = vmatprep.mubr.f32.mxu1 %v1956_v11  ;;  %v352_v11 = vld [vmem:[#allocation6 + $0x410] sm:$0xff]  ;;  %v403_v34 = vld [vmem:[#allocation6 + $0x5a8] sm:$0xff] }
  0x84   :  { %608 = vmatprep.subr.mxu0 %v377_v38  ;;  %497 = vmatmul.mubr.f32.gmra.mxu0 %v131_v39  ;;  %v401_v38 = vld [vmem:[#allocation6 + $0x598] sm:$0xff]  ;;  %v400_v39 = vld [vmem:[#allocation6 + $0x590] sm:$0xff] }
  0x85   :  { %609 = vmatpush1.msra.mxu0 %v376_v40  ;;  %586 = vmatmul.mubr.f32.gmra.mxu1 %v1958_v14  ;;  %v399_v40 = vld [vmem:[#allocation6 + $0x588] sm:$0xff] }
  0x86   :  { %610 = vmatprep.subr.mxu0 %v375_v32  ;;  %502 = vmatprep.mubr.f32.mxu0 %v211_v47  ;;  %v398_v32 = vld [vmem:[#allocation6 + $0x580] sm:$0xff]  ;;  %v392_v47 = vld [vmem:[#allocation6 + $0x550] sm:$0xff] }
  0x87   :  { %611 = vmatpush1.msra.mxu0 %v374_v41  ;;  %591 = vmatprep.mubr.f32.mxu1 %v1962_v18  ;;  %v397_v41 = vld [vmem:[#allocation6 + $0x578] sm:$0xff] }
  0x88   :  { %612 = vmatprep.subr.mxu0 %v373_v36  ;;  %503 = vmatmul.mubr.f32.gmra.mxu0 %v210_v49  ;;  %v395_v36 = vld [vmem:[#allocation6 + $0x568] sm:$0xff]  ;;  %v390_v49 = vld [vmem:[#allocation6 + $0x540] sm:$0xff] }
  0x89   :  { %613 = vmatpush1.msra.mxu0 %v372_v46  ;;  %592 = vmatmul.mubr.f32.gmra.mxu1 %v1967_v24  ;;  %v393_v46 = vld [vmem:[#allocation6 + $0x558] sm:$0xff] }
  0x8a   :  { %614 = vmatprep.subr.mxu0 %v371_v48  ;;  %508 = vmatprep.mubr.f32.mxu0 %v172_v51  ;;  %v391_v48 = vld [vmem:[#allocation6 + $0x548] sm:$0xff]  ;;  %v388_v51 = vld [vmem:[#allocation6 + $0x530] sm:$0xff] }
  0x8b   :  { %615 = vmatpush1.msra.mxu0 %v370_v50  ;;  %597 = vmatprep.mubr.f32.mxu1 %v1972_v27  ;;  %v389_v50 = vld [vmem:[#allocation6 + $0x538] sm:$0xff]  ;;  %v833_v27 = vld [vmem:[#allocation8 + $0xe0] sm:$0xff] }
  0x8c   :  { %616 = vmatprep.subr.mxu0 %v369_v53  ;;  %509 = vmatmul.mubr.f32.gmra.mxu0 %v170_v54  ;;  %v386_v53 = vld [vmem:[#allocation6 + $0x520] sm:$0xff]  ;;  %v385_v54 = vld [vmem:[#allocation6 + $0x518] sm:$0xff] }
  0x8d   :  { %617 = vmatpush1.msra.mxu0 %v368_v57  ;;  %598 = vmatmul.mubr.f32.gmra.mxu1 %v1976_v30  ;;  %v143_v57 = vrot.slane %v1946_v33, 1  ;;  %v181_v33 = vrot.slane %v1967_v24, 1  ;;  %v897_v24 = vld [vmem:[#allocation8 + $0x2e0] sm:$0xff]  ;;  %v831_v30 = vld [vmem:[#allocation8 + $0xd0] sm:$0xff] }
  0x8e   :  { %618 = vmatprep.subr.mxu0 %v367_v29  ;;  %668 = vmatprep.mubr.f32.mxu0 %v148_v59  ;;  %v384_v29 = vld [vmem:[#allocation6 + $0x510] sm:$0xff]  ;;  %v382_v59 = vld [vmem:[#allocation6 + $0x500] sm:$0xff] }
  0x8f   :  { %619 = vmatpush1.msra.mxu0 %v366_v58  ;;  %v383_v58 = vld [vmem:[#allocation6 + $0x508] sm:$0xff]  ;;  %v183_v14 = vsel %vm142_vm2, %v181_v33, %v182_v37  ;;  %v895_v37 = vld [vmem:[#allocation8 + $0x2d0] sm:$0xff] }
  0x90   :  { %620 = vmatprep.subr.mxu0 %v365_v60  ;;  %v145_v60 = vsel %vm142_vm2, %v143_v57, %v144_v19  ;;  %v900_v19 = vld [vmem:[#allocation8 + $0x2f8] sm:$0xff]  ;;  %v874_v57 = vld [vmem:[#allocation8 + $0x228] sm:$0xff]  ;;  %v871_v33 = vld [vmem:[#allocation8 + $0x210] sm:$0xff] }
  0x91   :  { %621 = vmatpush1.msra.mxu0 %v364_v61  ;;  %v184_v61 = vrot.slane %v1962_v18, 1  ;;  %v899_v18 = vld [vmem:[#allocation8 + $0x2f0] sm:$0xff] }
  0x92   :  { %622 = vmatprep.subr.mxu0 %v363_v1 }
  0x93   :  { %623 = vmatpush1.msra.mxu0 %v362_v62  ;;  %v186_v1 = vsel %vm142_vm2, %v184_v61, %v185_v31  ;;  %v836_v62 = vld [vmem:[#allocation8 + $0xf8] sm:$0xff]  ;;  %v807_v61 = vld [vmem:[#allocation8 + $0x10] sm:$0xff] }
  0x94   :  { %624 = vmatprep.subr.mxu0 %v361_v63  ;;  %1009 = vmatprep.subr.mxu1 %v836_v62  ;;  %v835_v63 = vld [vmem:[#allocation8 + $0xf0] sm:$0xff]  ;;  %v896_v31 = vld [vmem:[#allocation8 + $0x2d8] sm:$0xff]  ;;  %v869_v62 = vld [vmem:[#allocation8 + $0x200] sm:$0xff] }
  0x95   :  { %625 = vmatpush1.msra.mxu0 %v360_v3  ;;  %v834_v3 = vld [vmem:[#allocation8 + $0xe8] sm:$0xff]  ;;  %1010 = vmatpush1.msra.mxu1 %v835_v63  ;;  %v932_v63 = vld [vmem:[#allocation8 + $0x3f8] sm:$0xff] }
  0x96   :  { %626 = vmatprep.subr.mxu0 %v359_v4  ;;  %1011 = vmatprep.subr.mxu1 %v834_v3  ;;  %v830_v4 = vld [vmem:[#allocation8 + $0xc8] sm:$0xff]  ;;  %v931_v3 = vld [vmem:[#allocation8 + $0x3f0] sm:$0xff] }
  0x97   :  { %627 = vmatpush1.msra.mxu0 %v358_v5  ;;  %1012 = vmatpush1.msra.mxu1 %v833_v27  ;;  %v894_v5 = vld [vmem:[#allocation8 + $0x2c8] sm:$0xff] }
  0x98   :  { %628 = vmatprep.subr.mxu0 %v357_v6  ;;  %v829_v6 = vld [vmem:[#allocation8 + $0xc0] sm:$0xff]  ;;  %v930_v27 = vld [vmem:[#allocation8 + $0x3e8] sm:$0xff] }
  0x99   :  { %629 = vmatpush1.msra.mxu0 %v356_v7  ;;  %v893_v7 = vld [vmem:[#allocation8 + $0x2c0] sm:$0xff] }
  0x9a   :  { %630 = vmatprep.subr.mxu0 %v355_v8  ;;  %v828_v8 = vld [vmem:[#allocation8 + $0xb8] sm:$0xff] }
  0x9b   :  { %631 = vmatpush1.msra.mxu0 %v354_v9  ;;  %v892_v9 = vld [vmem:[#allocation8 + $0x2b8] sm:$0xff] }
  0x9c   :  { %632 = vmatprep.subr.mxu0 %v353_v10  ;;  %v827_v10 = vld [vmem:[#allocation8 + $0xb0] sm:$0xff] }
  0x9d   :  { %633 = vmatpush1.msra.mxu0 %v352_v11  ;;  %v826_v11 = vld [vmem:[#allocation8 + $0xa8] sm:$0xff] }
  0x9e   :  { %634 = vmatprep.subr.mxu0 %v351_v12  ;;  %v890_v12 = vld [vmem:[#allocation8 + $0x2a8] sm:$0xff] }
  0x9f   :  { %635 = vmatpush1.msra.mxu0 %v350_v13  ;;  %v825_v13 = vld [vmem:[#allocation8 + $0xa0] sm:$0xff] }
  0xa0   :  { %636 = vmatprep.subr.mxu0 %v413_v15  ;;  %v889_v15 = vld [vmem:[#allocation8 + $0x2a0] sm:$0xff] }
  0xa1   :  { %637 = vmatpush2.msra.mxu0 %v412_v16  ;;  %v824_v16 = vld [vmem:[#allocation8 + $0x98] sm:$0xff] }
  0xa2   :  { %638 = vmatprep.subr.mxu0 %v411_v17  ;;  %v823_v17 = vld [vmem:[#allocation8 + $0x90] sm:$0xff] }
  0xa3   :  { %639 = vmatpush2.msra.mxu0 %v410_v20  ;;  %v887_v20 = vld [vmem:[#allocation8 + $0x290] sm:$0xff] }
  0xa4   :  { %640 = vmatprep.subr.mxu0 %v409_v21  ;;  %v822_v21 = vld [vmem:[#allocation8 + $0x88] sm:$0xff] }
  0xa5   :  { %641 = vmatpush2.msra.mxu0 %v408_v22  ;;  %v886_v22 = vld [vmem:[#allocation8 + $0x288] sm:$0xff] }
  0xa6   :  { %642 = vmatprep.subr.mxu0 %v407_v23  ;;  %v821_v23 = vld [vmem:[#allocation8 + $0x80] sm:$0xff] }
  0xa7   :  { %643 = vmatpush2.msra.mxu0 %v406_v25  ;;  %v885_v25 = vld [vmem:[#allocation8 + $0x280] sm:$0xff] }
  0xa8   :  { %644 = vmatprep.subr.mxu0 %v405_v26  ;;  %v820_v26 = vld [vmem:[#allocation8 + $0x78] sm:$0xff] }
  0xa9   :  { %645 = vmatpush2.msra.mxu0 %v404_v28  ;;  %v884_v28 = vld [vmem:[#allocation8 + $0x278] sm:$0xff] }
  0xaa   :  { %646 = vmatprep.subr.mxu0 %v403_v34  ;;  %v819_v34 = vld [vmem:[#allocation8 + $0x70] sm:$0xff] }
  0xab   :  { %647 = vmatpush2.msra.mxu0 %v402_v35  ;;  %v883_v35 = vld [vmem:[#allocation8 + $0x270] sm:$0xff] }
  0xac   :  { %648 = vmatprep.subr.mxu0 %v401_v38  ;;  %v818_v38 = vld [vmem:[#allocation8 + $0x68] sm:$0xff] }
  0xad   :  { %649 = vmatpush2.msra.mxu0 %v400_v39  ;;  %v882_v39 = vld [vmem:[#allocation8 + $0x268] sm:$0xff] }
  0xae   :  { %650 = vmatprep.subr.mxu0 %v399_v40  ;;  %v817_v40 = vld [vmem:[#allocation8 + $0x60] sm:$0xff] }
  0xaf   :  { %651 = vmatpush2.msra.mxu0 %v398_v32  ;;  %v881_v32 = vld [vmem:[#allocation8 + $0x260] sm:$0xff] }
  0xb0   :  { %652 = vmatprep.subr.mxu0 %v397_v41  ;;  %v816_v41 = vld [vmem:[#allocation8 + $0x58] sm:$0xff] }
  0xb1   :  { %653 = vmatpush2.msra.mxu0 %v396_v42  ;;  %v880_v42 = vld [vmem:[#allocation8 + $0x258] sm:$0xff] }
  0xb2   :  { %654 = vmatprep.subr.mxu0 %v395_v36  ;;  %v815_v36 = vld [vmem:[#allocation8 + $0x50] sm:$0xff] }
  0xb3   :  { %655 = vmatpush2.msra.mxu0 %v394_v43  ;;  %v879_v43 = vld [vmem:[#allocation8 + $0x250] sm:$0xff] }
  0xb4   :  { %656 = vmatprep.subr.mxu0 %v393_v46  ;;  %v814_v46 = vld [vmem:[#allocation8 + $0x48] sm:$0xff] }
  0xb5   :  { %657 = vmatpush2.msra.mxu0 %v392_v47  ;;  %v878_v47 = vld [vmem:[#allocation8 + $0x248] sm:$0xff] }
  0xb6   :  { %658 = vmatprep.subr.mxu0 %v391_v48  ;;  %v813_v48 = vld [vmem:[#allocation8 + $0x40] sm:$0xff] }
  0xb7   :  { %659 = vmatpush2.msra.mxu0 %v390_v49  ;;  %v877_v49 = vld [vmem:[#allocation8 + $0x240] sm:$0xff] }
  0xb8   :  { %660 = vmatprep.subr.mxu0 %v389_v50  ;;  %v812_v50 = vld [vmem:[#allocation8 + $0x38] sm:$0xff] }
  0xb9   :  { %661 = vmatpush2.msra.mxu0 %v388_v51  ;;  %v876_v51 = vld [vmem:[#allocation8 + $0x238] sm:$0xff] }
  0xba   :  { %662 = vmatprep.subr.mxu0 %v387_v52  ;;  %v811_v52 = vld [vmem:[#allocation8 + $0x30] sm:$0xff] }
  0xbb   :  { %663 = vmatpush2.msra.mxu0 %v386_v53  ;;  %v875_v53 = vld [vmem:[#allocation8 + $0x230] sm:$0xff] }
  0xbc   :  { %664 = vmatprep.subr.mxu0 %v385_v54  ;;  %v810_v54 = vld [vmem:[#allocation8 + $0x28] sm:$0xff] }
  0xbd   :  { %665 = vmatpush2.msra.mxu0 %v384_v29  ;;  %v809_v29 = vld [vmem:[#allocation8 + $0x20] sm:$0xff] }
  0xbe   :  { %666 = vmatprep.subr.mxu0 %v383_v58  ;;  %v873_v58 = vld [vmem:[#allocation8 + $0x220] sm:$0xff] }
  0xbf   :  { %667 = vmatpush2.msra.mxu0 %v382_v59  ;;  %v808_v59 = vld [vmem:[#allocation8 + $0x18] sm:$0xff] }
  0xc0   :  { %669 = vmatmul.mubr.f32.vlgmr.msra.gmra.mxu0 %v145_v60  ;;  %1098 = vmatprep.subr.mxu0 %v900_v19  ;;  %v872_v60 = vld [vmem:[#allocation8 + $0x218] sm:$0xff]  ;;  %v805_v19 = vld [vmem:[#allocation8] sm:$0xff] }
  0xc1   :  { %674 = vmatprep.mubr.f32.mxu0 %v1995_v44  ;;  %v898_v44 = vld [vmem:[#allocation8 + $0x2e8] sm:$0xff]  ;;  %1099 = vmatpush1.msra.mxu0 %v899_v18  ;;  %v868_v18 = vld [vmem:[#allocation8 + $0x1f8] sm:$0xff] }
  0xc2   :  { %1100 = vmatprep.subr.mxu0 %v898_v44  ;;  %v867_v44 = vld [vmem:[#allocation8 + $0x1f0] sm:$0xff] }
  0xc3   :  { %1101 = vmatpush1.msra.mxu0 %v897_v24  ;;  %v866_v24 = vld [vmem:[#allocation8 + $0x1e8] sm:$0xff] }
  0xc4   :  { %675 = vmatmul.mubr.f32.gmra.mxu0 %v1997_v45  ;;  %v832_v45 = vld [vmem:[#allocation8 + $0xd8] sm:$0xff]  ;;  %1102 = vmatprep.subr.mxu0 %v896_v31  ;;  %v865_v31 = vld [vmem:[#allocation8 + $0x1e0] sm:$0xff] }
  0xc5   :  { %680 = vmatprep.mubr.f32.mxu0 %v186_v1  ;;  %1013 = vmatprep.subr.mxu1 %v832_v45  ;;  %v806_v1 = vld [vmem:[#allocation8 + $0x8] sm:$0xff]  ;;  %v929_v45 = vld [vmem:[#allocation8 + $0x3e0] sm:$0xff] }
  0xc6   :  { %1014 = vmatpush1.msra.mxu1 %v831_v30  ;;  %1103 = vmatpush1.msra.mxu0 %v895_v37  ;;  %v864_v30 = vld [vmem:[#allocation8 + $0x1d8] sm:$0xff] }
  0xc7   :  { %1015 = vmatprep.subr.mxu1 %v830_v4  ;;  %1104 = vmatprep.subr.mxu0 %v894_v5  ;;  %v928_v37 = vld [vmem:[#allocation8 + $0x3d8] sm:$0xff]  ;;  %v863_v4 = vld [vmem:[#allocation8 + $0x1d0] sm:$0xff] }
  0xc8   :  { %681 = vmatmul.mubr.f32.gmra.mxu0 %v183_v14  ;;  %1016 = vmatpush1.msra.mxu1 %v829_v6  ;;  %v870_v14 = vld [vmem:[#allocation8 + $0x208] sm:$0xff]  ;;  %v927_v5 = vld [vmem:[#allocation8 + $0x3d0] sm:$0xff] }
  0xc9   :  { %686 = vmatprep.mubr.f32.mxu0 %v2010_v55  ;;  %v891_v55 = vld [vmem:[#allocation8 + $0x2b0] sm:$0xff]  ;;  %1105 = vmatpush1.msra.mxu0 %v893_v7  ;;  %v862_v6 = vld [vmem:[#allocation8 + $0x1c8] sm:$0xff] }
  0xca   :  { %1017 = vmatprep.subr.mxu1 %v828_v8  ;;  %1106 = vmatprep.subr.mxu0 %v892_v9  ;;  %v926_v7 = vld [vmem:[#allocation8 + $0x3c8] sm:$0xff]  ;;  %v861_v8 = vld [vmem:[#allocation8 + $0x1c0] sm:$0xff] }
  0xcb   :  { %1018 = vmatpush1.msra.mxu1 %v827_v10  ;;  %1107 = vmatpush1.msra.mxu0 %v891_v55  ;;  %v925_v9 = vld [vmem:[#allocation8 + $0x3c0] sm:$0xff]  ;;  %v860_v10 = vld [vmem:[#allocation8 + $0x1b8] sm:$0xff] }
  0xcc   :  { %687 = vmatmul.mubr.f32.gmra.mxu0 %v2012_v56  ;;  %1019 = vmatprep.subr.mxu1 %v826_v11  ;;  %v888_v56 = vld [vmem:[#allocation8 + $0x298] sm:$0xff]  ;;  %v859_v11 = vld [vmem:[#allocation8 + $0x1b0] sm:$0xff] }
  0xcd   :  { %1108 = vmatprep.subr.mxu0 %v890_v12  ;;  %1020 = vmatpush1.msra.mxu1 %v825_v13  ;;  %v924_v55 = vld [vmem:[#allocation8 + $0x3b8] sm:$0xff]  ;;  %v923_v12 = vld [vmem:[#allocation8 + $0x3b0] sm:$0xff]  ;;  %v858_v13 = vld [vmem:[#allocation8 + $0x1a8] sm:$0xff] }
  0xce   :  { %1109 = vmatpush1.msra.mxu0 %v889_v15  ;;  %1021 = vmatprep.subr.mxu1 %v824_v16  ;;  %v922_v15 = vld [vmem:[#allocation8 + $0x3a8] sm:$0xff]  ;;  %v857_v16 = vld [vmem:[#allocation8 + $0x1a0] sm:$0xff] }
  0xcf   :  { %1110 = vmatprep.subr.mxu0 %v888_v56  ;;  %1022 = vmatpush1.msra.mxu1 %v823_v17  ;;  %v921_v56 = vld [vmem:[#allocation8 + $0x3a0] sm:$0xff]  ;;  %v856_v17 = vld [vmem:[#allocation8 + $0x198] sm:$0xff] }
  0xd0   :  { %1111 = vmatpush1.msra.mxu0 %v887_v20  ;;  %1023 = vmatprep.subr.mxu1 %v822_v21  ;;  %v920_v20 = vld [vmem:[#allocation8 + $0x398] sm:$0xff]  ;;  %v855_v21 = vld [vmem:[#allocation8 + $0x190] sm:$0xff] }
  0xd1   :  { %1112 = vmatprep.subr.mxu0 %v886_v22  ;;  %1024 = vmatpush1.msra.mxu1 %v821_v23  ;;  %v919_v22 = vld [vmem:[#allocation8 + $0x390] sm:$0xff]  ;;  %v854_v23 = vld [vmem:[#allocation8 + $0x188] sm:$0xff] }
  0xd2   :  { %1113 = vmatpush1.msra.mxu0 %v885_v25  ;;  %1025 = vmatprep.subr.mxu1 %v820_v26  ;;  %v918_v25 = vld [vmem:[#allocation8 + $0x388] sm:$0xff]  ;;  %v917_v26 = vld [vmem:[#allocation8 + $0x380] sm:$0xff] }
  0xd3   :  { %1114 = vmatprep.subr.mxu0 %v884_v28  ;;  %1026 = vmatpush1.msra.mxu1 %v819_v34  ;;  %v916_v28 = vld [vmem:[#allocation8 + $0x378] sm:$0xff]  ;;  %v915_v34 = vld [vmem:[#allocation8 + $0x370] sm:$0xff] }
  0xd4   :  { %1115 = vmatpush1.msra.mxu0 %v883_v35  ;;  %1027 = vmatprep.subr.mxu1 %v818_v38  ;;  %v914_v35 = vld [vmem:[#allocation8 + $0x368] sm:$0xff]  ;;  %v913_v38 = vld [vmem:[#allocation8 + $0x360] sm:$0xff] }
  0xd5   :  { %1116 = vmatprep.subr.mxu0 %v882_v39  ;;  %1028 = vmatpush1.msra.mxu1 %v817_v40  ;;  %v912_v39 = vld [vmem:[#allocation8 + $0x358] sm:$0xff]  ;;  %v911_v40 = vld [vmem:[#allocation8 + $0x350] sm:$0xff] }
  0xd6   :  { %1117 = vmatpush1.msra.mxu0 %v881_v32  ;;  %1029 = vmatprep.subr.mxu1 %v816_v41  ;;  %v910_v32 = vld [vmem:[#allocation8 + $0x348] sm:$0xff]  ;;  %v909_v41 = vld [vmem:[#allocation8 + $0x340] sm:$0xff] }
  0xd7   :  { %1118 = vmatprep.subr.mxu0 %v880_v42  ;;  %1030 = vmatpush1.msra.mxu1 %v815_v36  ;;  %v853_v42 = vld [vmem:[#allocation8 + $0x180] sm:$0xff]  ;;  %v852_v36 = vld [vmem:[#allocation8 + $0x178] sm:$0xff] }
  0xd8   :  { %1119 = vmatpush1.msra.mxu0 %v879_v43  ;;  %1031 = vmatprep.subr.mxu1 %v814_v46  ;;  %v908_v43 = vld [vmem:[#allocation8 + $0x338] sm:$0xff]  ;;  %v851_v46 = vld [vmem:[#allocation8 + $0x170] sm:$0xff] }
  0xd9   :  { %1120 = vmatprep.subr.mxu0 %v878_v47  ;;  %1032 = vmatpush1.msra.mxu1 %v813_v48  ;;  %v907_v47 = vld [vmem:[#allocation8 + $0x330] sm:$0xff]  ;;  %v850_v48 = vld [vmem:[#allocation8 + $0x168] sm:$0xff] }
  0xda   :  { %1121 = vmatpush1.msra.mxu0 %v877_v49  ;;  %1033 = vmatprep.subr.mxu1 %v812_v50  ;;  %v906_v49 = vld [vmem:[#allocation8 + $0x328] sm:$0xff]  ;;  %v849_v50 = vld [vmem:[#allocation8 + $0x160] sm:$0xff] }
  0xdb   :  { %1122 = vmatprep.subr.mxu0 %v876_v51  ;;  %1034 = vmatpush1.msra.mxu1 %v811_v52  ;;  %v905_v51 = vld [vmem:[#allocation8 + $0x320] sm:$0xff]  ;;  %v848_v52 = vld [vmem:[#allocation8 + $0x158] sm:$0xff] }
  0xdc   :  { %1123 = vmatpush1.msra.mxu0 %v875_v53  ;;  %1035 = vmatprep.subr.mxu1 %v810_v54  ;;  %v904_v53 = vld [vmem:[#allocation8 + $0x318] sm:$0xff]  ;;  %v847_v54 = vld [vmem:[#allocation8 + $0x150] sm:$0xff] }
  0xdd   :  { %1124 = vmatprep.subr.mxu0 %v874_v57  ;;  %1036 = vmatpush1.msra.mxu1 %v809_v29  ;;  %v903_v57 = vld [vmem:[#allocation8 + $0x310] sm:$0xff]  ;;  %v846_v29 = vld [vmem:[#allocation8 + $0x148] sm:$0xff] }
  0xde   :  { %1125 = vmatpush1.msra.mxu0 %v873_v58  ;;  %1037 = vmatprep.subr.mxu1 %v808_v59  ;;  %v902_v58 = vld [vmem:[#allocation8 + $0x308] sm:$0xff]  ;;  %v901_v59 = vld [vmem:[#allocation8 + $0x300] sm:$0xff] }
  0xdf   :  { %1126 = vmatprep.subr.mxu0 %v872_v60  ;;  %1038 = vmatpush1.msra.mxu1 %v807_v61  ;;  %v845_v60 = vld [vmem:[#allocation8 + $0x140] sm:$0xff]  ;;  %v844_v61 = vld [vmem:[#allocation8 + $0x138] sm:$0xff] }
  0xe0   :  { %1127 = vmatpush1.msra.mxu0 %v871_v33  ;;  %1039 = vmatprep.subr.mxu1 %v806_v1  ;;  %v843_v33 = vld [vmem:[#allocation8 + $0x130] sm:$0xff]  ;;  %v842_v1 = vld [vmem:[#allocation8 + $0x128] sm:$0xff] }
  0xe1   :  { %1128 = vmatprep.subr.mxu0 %v870_v14  ;;  %1040 = vmatpush1.msra.mxu1 %v805_v19  ;;  %v841_v14 = vld [vmem:[#allocation8 + $0x120] sm:$0xff]  ;;  %v840_v19 = vld [vmem:[#allocation8 + $0x118] sm:$0xff] }
  0xe2   :  { %1129 = vmatpush1.msra.mxu0 %v869_v62  ;;  %1041 = vmatprep.subr.mxu1 %v868_v18  ;;  %v839_v62 = vld [vmem:[#allocation8 + $0x110] sm:$0xff]  ;;  %v838_v18 = vld [vmem:[#allocation8 + $0x108] sm:$0xff] }
  0xe3   :  { %1130 = vmatprep.subr.mxu0 %v932_v63  ;;  %1042 = vmatpush2.msra.mxu1 %v867_v44  ;;  %v837_v63 = vld [vmem:[#allocation8 + $0x100] sm:$0xff]  ;;  %v964_v44 = vld [vmem:[#allocation8 + $0x4f8] sm:$0xff] }
  0xe4   :  { %1131 = vmatpush2.msra.mxu0 %v931_v3  ;;  %1043 = vmatprep.subr.mxu1 %v866_v24 }
  0xe5   :  { %1132 = vmatprep.subr.mxu0 %v930_v27  ;;  %1044 = vmatpush2.msra.mxu1 %v865_v31 }
  0xe6   :  { %1133 = vmatpush2.msra.mxu0 %v929_v45  ;;  %1045 = vmatprep.subr.mxu1 %v864_v30  ;;  %v2040_v45 = vshrl.u32 %v117_v0, 7 }
  0xe7   :  { %1134 = vmatprep.subr.mxu0 %v928_v37  ;;  %1046 = vmatpush2.msra.mxu1 %v863_v4 }
  0xe8   :  { %1135 = vmatpush2.msra.mxu0 %v927_v5  ;;  %1047 = vmatprep.subr.mxu1 %v862_v6  ;;  %v2043_v4 = vsub.s32 0, %v2040_v45  ;;  %v414_v5 = vld [vmem:[%s2132_s2] sm:$0x3] }
  0xe9   :  { %1136 = vmatprep.subr.mxu0 %v926_v7  ;;  %1048 = vmatpush2.msra.mxu1 %v861_v8  ;;  %v2049_v7 = vsub.s32 1, %v2040_v45 }
  0xea   :  { %1137 = vmatpush2.msra.mxu0 %v925_v9  ;;  %1049 = vmatprep.subr.mxu1 %v860_v10  ;;  %v419_v10 = vrot.slane %v414_v5, %v2043_v4 }
  0xeb   :  { %1138 = vmatprep.subr.mxu0 %v924_v55  ;;  %1050 = vmatpush2.msra.mxu1 %v859_v11  ;;  %v423_v0 = vrot.slane %v414_v5, %v2049_v7 }
  0xec   :  { %1139 = vmatpush2.msra.mxu0 %v923_v12  ;;  %1051 = vmatprep.subr.mxu1 %v858_v13 }
  0xed   :  { %1140 = vmatprep.subr.mxu0 %v922_v15  ;;  %1052 = vmatpush2.msra.mxu1 %v857_v16 }
  0xee   :  { %1141 = vmatpush2.msra.mxu0 %v921_v56  ;;  %1053 = vmatprep.subr.mxu1 %v856_v17 }
  0xef   :  { %1142 = vmatprep.subr.mxu0 %v920_v20  ;;  %1054 = vmatpush2.msra.mxu1 %v855_v21 }
  0xf0   :  { %1143 = vmatpush2.msra.mxu0 %v919_v22  ;;  %1055 = vmatprep.subr.mxu1 %v854_v23 }
  0xf1   :  { %1144 = vmatprep.subr.mxu0 %v918_v25  ;;  %1056 = vmatpush2.msra.mxu1 %v853_v42 }
  0xf2   :  { %1145 = vmatpush2.msra.mxu0 %v917_v26  ;;  %1057 = vmatprep.subr.mxu1 %v852_v36 }
  0xf3   :  { %1146 = vmatprep.subr.mxu0 %v916_v28  ;;  %1058 = vmatpush2.msra.mxu1 %v851_v46 }
  0xf4   :  { %1147 = vmatpush2.msra.mxu0 %v915_v34  ;;  %1059 = vmatprep.subr.mxu1 %v850_v48 }
  0xf5   :  { %1148 = vmatprep.subr.mxu0 %v914_v35  ;;  %1060 = vmatpush2.msra.mxu1 %v849_v50 }
  0xf6   :  { %1149 = vmatpush2.msra.mxu0 %v913_v38  ;;  %1061 = vmatprep.subr.mxu1 %v848_v52 }
  0xf7   :  { %1150 = vmatprep.subr.mxu0 %v912_v39  ;;  %1062 = vmatpush2.msra.mxu1 %v847_v54 }
  0xf8   :  { %1151 = vmatpush2.msra.mxu0 %v911_v40  ;;  %1063 = vmatprep.subr.mxu1 %v846_v29 }
  0xf9   :  { %1152 = vmatprep.subr.mxu0 %v910_v32  ;;  %1064 = vmatpush2.msra.mxu1 %v845_v60 }
  0xfa   :  { %1153 = vmatpush2.msra.mxu0 %v909_v41  ;;  %1065 = vmatprep.subr.mxu1 %v844_v61 }
  0xfb   :  { %1154 = vmatprep.subr.mxu0 %v908_v43  ;;  %1066 = vmatpush2.msra.mxu1 %v843_v33 }
  0xfc   :  { %1155 = vmatpush2.msra.mxu0 %v907_v47  ;;  %1067 = vmatprep.subr.mxu1 %v842_v1 }
  0xfd   :  { %1156 = vmatprep.subr.mxu0 %v906_v49  ;;  %1068 = vmatpush2.msra.mxu1 %v841_v14 }
  0xfe   :  { %1157 = vmatpush2.msra.mxu0 %v905_v51  ;;  %1069 = vmatprep.subr.mxu1 %v840_v19 }
  0xff   :  { %1158 = vmatprep.subr.mxu0 %v904_v53  ;;  %1070 = vmatpush2.msra.mxu1 %v839_v62 }
 0x100   :  { %1159 = vmatpush2.msra.mxu0 %v903_v57  ;;  %1071 = vmatprep.subr.mxu1 %v838_v18 }
 0x101   :  { %1160 = vmatprep.subr.mxu0 %v902_v58  ;;  %1072 = vmatpush2.msra.mxu1 %v837_v63 }
 0x102   :  { %1161 = vmatpush2.msra.mxu0 %v901_v59  ;;  %1187 = vmatprep.subr.mxu1 %v964_v44 }
 0x13e   :  { %v492_v3 = vpop.f32.mrf.mxu0 }
 0x13f   :  { %v493_v12 = vadd.f32 %v492_v3, %v419_v10 }
 0x140   :  { %v494_v24 = vpop.f32.mrf.mxu0 }
 0x141   :  { %v581_v30 = vpop.f32.mrf.mxu1  ;;  %v495_v13 = vadd.f32 %v494_v24, %v423_v0 }
 0x142   :  { %v582_v56 = vadd.f32 %v581_v30, %v493_v12 }
 0x143   :  { %v583_v6 = vpop.f32.mrf.mxu1 }
 0x144   :  { %v498_v27 = vpop.f32.mrf.mxu0  ;;  %v584_v21 = vadd.f32 %v583_v6, %v495_v13 }
 0x145   :  { %v587_v8 = vpop.f32.mrf.mxu1  ;;  %v499_v17 = vadd.f32 %v498_v27, %v419_v10 }
 0x146   :  { %v500_v31 = vpop.f32.mrf.mxu0 }
 0x147   :  { %v589_v55 = vpop.f32.mrf.mxu1  ;;  %v501_v22 = vadd.f32 %v500_v31, %v423_v0  ;;  %v588_v28 = vadd.f32 %v587_v8, %v499_v17  ;;  %v962_v17 = vld [vmem:[#allocation8 + $0x4e8] sm:$0xff] }
 0x148   :  { %v504_v37 = vpop.f32.mrf.mxu0 }
 0x149   :  { %v593_v15 = vpop.f32.mrf.mxu1  ;;  %v505_v34 = vadd.f32 %v504_v37, %v419_v10  ;;  %v590_v40 = vadd.f32 %v589_v55, %v501_v22 }
 0x14a   :  { %v506_v9 = vpop.f32.mrf.mxu0 }
 0x14b   :  { %v595_v25 = vpop.f32.mrf.mxu1  ;;  %v507_v36 = vadd.f32 %v506_v9, %v423_v0  ;;  %v594_v48 = vadd.f32 %v593_v15, %v505_v34  ;;  %v959_v34 = vld [vmem:[#allocation8 + $0x4d0] sm:$0xff] }
 0x14c   :  { %v510_v11 = vpop.f32.mrf.mxu0 }
 0x14d   :  { %v511_v43 = vadd.f32 %v510_v11, %v419_v10  ;;  %v599_v46 = vpop.f32.mrf.mxu1  ;;  %v596_v60 = vadd.f32 %v595_v25, %v507_v36  ;;  %v963_v11 = vld [vmem:[#allocation8 + $0x4f0] sm:$0xff]  ;;  %v954_v36 = vld [vmem:[#allocation8 + $0x4a8] sm:$0xff] }
 0x14e   :  { %v512_v16 = vpop.f32.mrf.mxu0 }
 0x14f   :  { %v513_v52 = vadd.f32 %v512_v16, %v423_v0  ;;  %v600_v61 = vadd.f32 %v599_v46, %v511_v43  ;;  %v601_v33 = vpop.f32.mrf.mxu1  ;;  %v953_v43 = vld [vmem:[#allocation8 + $0x4a0] sm:$0xff] }
 0x151   :  { %v602_v27 = vadd.f32 %v601_v33, %v513_v52  ;;  %v947_v52 = vld [vmem:[#allocation8 + $0x470] sm:$0xff]  ;;  %v938_v33 = vld [vmem:[#allocation8 + $0x428] sm:$0xff] }
 0x180   :  { %v670_v20 = vpop.f32.mrf.mxu0 }
 0x181   :  { %v671_v23 = vadd.f32 %v670_v20, %v582_v56 }
 0x182   :  { %v672_v26 = vpop.f32.mrf.mxu0 }
 0x183   :  { %v693_v35 = vmax.f32 %v671_v23, 0.0  ;;  %v673_v38 = vadd.f32 %v672_v26, %v584_v21  ;;  %v961_v21 = vld [vmem:[#allocation8 + $0x4e0] sm:$0xff] }
 0x184   :  { %v676_v39 = vpop.f32.mrf.mxu0 }
 0x185   :  { %v715_v32 = vrot.slane %v693_v35, 7  ;;  %v694_v41 = vmax.f32 %v673_v38, 0.0  ;;  %v677_v42 = vadd.f32 %v676_v39, %v588_v28  ;;  %v729_v53 = vrot.slane %v693_v35, 1  ;;  %v960_v28 = vld [vmem:[#allocation8 + $0x4d8] sm:$0xff]  ;;  %v958_v39 = vld [vmem:[#allocation8 + $0x4c8] sm:$0xff] }
 0x186   :  { %v678_v47 = vpop.f32.mrf.mxu0 }
 0x187   :  { %725 = vst [vmem:[#allocation2] sm:$0xfe] %v715_v32  ;;  %v716_v49 = vrot.slane %v694_v41, 7  ;;  %v695_v50 = vmax.f32 %v677_v42, 0.0  ;;  %v679_v51 = vadd.f32 %v678_v47, %v590_v40  ;;  %1162 = vmatprep.mubr.f32.mxu0 %v694_v41  ;;  %v732_v1 = vrot.slane %v694_v41, 1  ;;  %v957_v40 = vld [vmem:[#allocation8 + $0x4c0] sm:$0xff] }
 0x188   :  { %v682_v54 = vpop.f32.mrf.mxu0  ;;  %1163 = vmatmul.mubr.f32.vlgmr.msra.gmra.mxu0 %v693_v35  ;;  %v955_v41 = vld [vmem:[#allocation8 + $0x4b0] sm:$0xff]  ;;  %v952_v47 = vld [vmem:[#allocation8 + $0x498] sm:$0xff] }
 0x189   :  { %726 = vst [vmem:[#allocation2 + $0x8] sm:$0xfe] %v716_v49  ;;  %v717_v57 = vrot.slane %v695_v50, 7  ;;  %v730_v29 = vrot.slane %v695_v50, 1  ;;  %v696_v58 = vmax.f32 %v679_v51, 0.0  ;;  %v683_v59 = vadd.f32 %v682_v54, %v594_v48  ;;  %v951_v48 = vld [vmem:[#allocation8 + $0x490] sm:$0xff] }
 0x18a   :  { %v684_v14 = vpop.f32.mrf.mxu0  ;;  %v948_v51 = vld [vmem:[#allocation8 + $0x478] sm:$0xff]  ;;  %v945_v54 = vld [vmem:[#allocation8 + $0x460] sm:$0xff] }
 0x18b   :  { %v718_v19 = vsel %vm127_vm1, %v715_v32, %v717_v57  ;;  %v2055_v62 = vsel %vm142_vm2, %v729_v53, %v730_v29  ;;  %741 = vst [vmem:[#allocation2 + $0x50] sm:$0x7f] %v730_v29  ;;  %v719_v18 = vrot.slane %v696_v58, 7  ;;  %v733_v63 = vrot.slane %v696_v58, 1  ;;  %1168 = vmatprep.mubr.f32.mxu0 %v696_v58  ;;  %v956_v32 = vld [vmem:[#allocation8 + $0x4b8] sm:$0xff]  ;;  %v946_v53 = vld [vmem:[#allocation8 + $0x468] sm:$0xff] }
 0x18c   :  { %v697_v44 = vmax.f32 %v683_v59, 0.0  ;;  %v685_v3 = vadd.f32 %v684_v14, %v596_v60  ;;  %v688_v24 = vpop.f32.mrf.mxu0  ;;  %1169 = vmatmul.mubr.f32.gmra.mxu0 %v695_v50  ;;  %v949_v50 = vld [vmem:[#allocation8 + $0x480] sm:$0xff]  ;;  %v944_v57 = vld [vmem:[#allocation8 + $0x458] sm:$0xff]  ;;  %v943_v29 = vld [vmem:[#allocation8 + $0x450] sm:$0xff] }
 0x18d   :  { %v720_v31 = vsel %vm127_vm1, %v716_v49, %v719_v18  ;;  %v2059_v30 = vsel %vm142_vm2, %v732_v1, %v733_v63  ;;  %742 = vst [vmem:[#allocation2 + $0x58] sm:$0x7f] %v733_v63  ;;  %v689_v37 = vadd.f32 %v688_v24, %v600_v61  ;;  %v950_v49 = vld [vmem:[#allocation8 + $0x488] sm:$0xff]  ;;  %v941_v59 = vld [vmem:[#allocation8 + $0x440] sm:$0xff]  ;;  %v940_v60 = vld [vmem:[#allocation8 + $0x438] sm:$0xff] }
 0x18e   :  { %v751_v5 = vrot.slane %v697_v44, 7  ;;  %v698_v6 = vmax.f32 %v685_v3, 0.0  ;;  %v690_v8 = vpop.f32.mrf.mxu0  ;;  %v765_v12 = vrot.slane %v697_v44, 1  ;;  %v781_v56 = vld [vmem:[#allocation2] sm:$0xff]  ;;  %v942_v58 = vld [vmem:[#allocation8 + $0x448] sm:$0xff]  ;;  %v939_v61 = vld [vmem:[#allocation8 + $0x430] sm:$0xff] }
 0x18f   :  { %v699_v9 = vmax.f32 %v689_v37, 0.0  ;;  %v691_v10 = vadd.f32 %v690_v8, %v602_v27  ;;  %v937_v1 = vld [vmem:[#allocation8 + $0x420] sm:$0xff]  ;;  %v936_v14 = vld [vmem:[#allocation8 + $0x418] sm:$0xff]  ;;  %v934_v18 = vld [vmem:[#allocation8 + $0x408] sm:$0xff] }
 0x190   :  { %761 = vst [vmem:[#allocation2 + $0x60] sm:$0xfe] %v751_v5  ;;  %v752_v0 = vrot.slane %v698_v6, 7  ;;  %v782_v55 = vld [vmem:[#allocation2 + $0x8] sm:$0xff]  ;;  %1174 = vmatprep.mubr.f32.mxu0 %v698_v6  ;;  %v768_v20 = vrot.slane %v698_v6, 1  ;;  %v933_v63 = vld [vmem:[#allocation8 + $0x400] sm:$0xff] }
 0x191   :  { %v753_v13 = vrot.slane %v699_v9, 7  ;;  %v766_v15 = vrot.slane %v699_v9, 1  ;;  %v700_v16 = vmax.f32 %v691_v10, 0.0  ;;  %1073 = vmatprep.mubr.f32.mxu1 %v782_v55  ;;  %1175 = vmatmul.mubr.f32.gmra.mxu0 %v697_v44  ;;  %v996_v44 = vld [vmem:[#allocation8 + $0x5f8] sm:$0xff]  ;;  %v995_v3 = vld [vmem:[#allocation8 + $0x5f0] sm:$0xff]  ;;  %v994_v24 = vld [vmem:[#allocation8 + $0x5e8] sm:$0xff] }
 0x192   :  { %762 = vst [vmem:[#allocation2 + $0x68] sm:$0xfe] %v752_v0  ;;  %1074 = vmatmul.mubr.f32.vlgmr.msra.gmra.mxu1 %v781_v56  ;;  %v993_v27 = vld [vmem:[#allocation8 + $0x5e0] sm:$0xff]  ;;  %v990_v37 = vld [vmem:[#allocation8 + $0x5c8] sm:$0xff]  ;;  %v988_v6 = vld [vmem:[#allocation8 + $0x5b8] sm:$0xff] }
 0x193   :  { %v754_v22 = vsel %vm127_vm1, %v751_v5, %v753_v13  ;;  %v2063_v23 = vsel %vm142_vm2, %v765_v12, %v766_v15  ;;  %777 = vst [vmem:[#allocation2 + $0xb0] sm:$0x7f] %v766_v15  ;;  %v755_v25 = vrot.slane %v700_v16, 7  ;;  %v769_v26 = vrot.slane %v700_v16, 1  ;;  %1188 = vmatpush1.msra.mxu1 %v963_v11  ;;  %1079 = vmatprep.mubr.f32.mxu1 %v720_v31  ;;  %v992_v31 = vld [vmem:[#allocation8 + $0x5d8] sm:$0xff]  ;;  %v989_v5 = vld [vmem:[#allocation8 + $0x5c0] sm:$0xff] }
 0x194   :  { %1189 = vmatprep.subr.mxu1 %v962_v17  ;;  %1180 = vmatprep.mubr.f32.mxu0 %v700_v16  ;;  %v987_v8 = vld [vmem:[#allocation8 + $0x5b0] sm:$0xff]  ;;  %v985_v10 = vld [vmem:[#allocation8 + $0x5a0] sm:$0xff]  ;;  %v982_v11 = vld [vmem:[#allocation8 + $0x588] sm:$0xff] }
 0x195   :  { %v756_v35 = vsel %vm127_vm1, %v752_v0, %v755_v25  ;;  %v2067_v38 = vsel %vm142_vm2, %v768_v20, %v769_v26  ;;  %778 = vst [vmem:[#allocation2 + $0xb8] sm:$0x7f] %v769_v26  ;;  %1190 = vmatpush1.msra.mxu1 %v961_v21  ;;  %1181 = vmatmul.mubr.f32.gmra.mxu0 %v699_v9  ;;  %v986_v9 = vld [vmem:[#allocation8 + $0x5a8] sm:$0xff]  ;;  %v984_v0 = vld [vmem:[#allocation8 + $0x598] sm:$0xff]  ;;  %v983_v55 = vld [vmem:[#allocation8 + $0x590] sm:$0xff] }
 0x196   :  { %1191 = vmatprep.subr.mxu1 %v960_v28  ;;  %1080 = vmatmul.mubr.f32.gmra.mxu1 %v718_v19  ;;  %v935_v19 = vld [vmem:[#allocation8 + $0x410] sm:$0xff]  ;;  %v981_v12 = vld [vmem:[#allocation8 + $0x580] sm:$0xff]  ;;  %v980_v13 = vld [vmem:[#allocation8 + $0x578] sm:$0xff] }
 0x197   :  { %1192 = vmatpush1.msra.mxu1 %v959_v34  ;;  %v793_v46 = vld [vmem:[#allocation2 + $0x60] sm:$0xff]  ;;  %v979_v15 = vld [vmem:[#allocation8 + $0x570] sm:$0xff]  ;;  %v978_v16 = vld [vmem:[#allocation8 + $0x568] sm:$0xff] }
 0x198   :  { %1193 = vmatprep.subr.mxu1 %v958_v39  ;;  %v977_v56 = vld [vmem:[#allocation8 + $0x560] sm:$0xff]  ;;  %v976_v17 = vld [vmem:[#allocation8 + $0x558] sm:$0xff]  ;;  %v975_v20 = vld [vmem:[#allocation8 + $0x550] sm:$0xff] }
 0x199   :  { %1194 = vmatpush1.msra.mxu1 %v957_v40  ;;  %v794_v42 = vld [vmem:[#allocation2 + $0x68] sm:$0xff]  ;;  %v972_v25 = vld [vmem:[#allocation8 + $0x538] sm:$0xff]  ;;  %v971_v26 = vld [vmem:[#allocation8 + $0x530] sm:$0xff] }
 0x19a   :  { %1085 = vmatprep.mubr.f32.mxu1 %v794_v42  ;;  %1195 = vmatprep.subr.mxu1 %v956_v32  ;;  %v974_v21 = vld [vmem:[#allocation8 + $0x548] sm:$0xff]  ;;  %v969_v34 = vld [vmem:[#allocation8 + $0x520] sm:$0xff]  ;;  %v967_v39 = vld [vmem:[#allocation8 + $0x510] sm:$0xff] }
 0x19b   :  { %1196 = vmatpush1.msra.mxu1 %v955_v41  ;;  %v970_v28 = vld [vmem:[#allocation8 + $0x528] sm:$0xff]  ;;  %v965_v32 = vld [vmem:[#allocation8 + $0x500] sm:$0xff]  ;;  %v792_v41 = vld [vmem:[#allocation2 + $0x58] sm:$0xff] }
 0x19c   :  { %1086 = vmatmul.mubr.f32.gmra.mxu1 %v793_v46  ;;  %1197 = vmatprep.subr.mxu1 %v954_v36  ;;  %v966_v40 = vld [vmem:[#allocation8 + $0x508] sm:$0xff]  ;;  %v791_v42 = vld [vmem:[#allocation2 + $0x50] sm:$0xff]  ;;  %v804_v36 = vld [vmem:[#allocation2 + $0xb8] sm:$0xff] }
 0x19d   :  { %1198 = vmatpush1.msra.mxu1 %v953_v43  ;;  %1091 = vmatprep.mubr.f32.mxu1 %v756_v35  ;;  %v968_v35 = vld [vmem:[#allocation8 + $0x518] sm:$0xff]  ;;  %v803_v43 = vld [vmem:[#allocation2 + $0xb0] sm:$0xff] }
 0x19e   :  { %1199 = vmatprep.subr.mxu1 %v952_v47  ;;  %v1340_v46 = vld [vmem:[#allocation9 + $0xf8] sm:$0xff] }
 0x19f   :  { %1200 = vmatpush1.msra.mxu1 %v951_v48  ;;  %1646 = vmatprep.subr.mxu0 %v1340_v46  ;;  %v1324_v47 = vld [vmem:[#allocation9 + $0x78] sm:$0xff]  ;;  %v1339_v48 = vld [vmem:[#allocation9 + $0xf0] sm:$0xff] }
 0x1a0   :  { %1092 = vmatmul.mubr.f32.gmra.mxu1 %v754_v22  ;;  %1201 = vmatprep.subr.mxu1 %v950_v49  ;;  %v973_v22 = vld [vmem:[#allocation8 + $0x540] sm:$0xff]  ;;  %v1338_v49 = vld [vmem:[#allocation9 + $0xe8] sm:$0xff] }
 0x1a1   :  { %1202 = vmatpush1.msra.mxu1 %v949_v50  ;;  %1251 = vmatprep.mubr.f32.mxu1 %v2059_v30  ;;  %v991_v30 = vld [vmem:[#allocation8 + $0x5d0] sm:$0xff]  ;;  %v1322_v50 = vld [vmem:[#allocation9 + $0x68] sm:$0xff] }
 0x1a2   :  { %1203 = vmatprep.subr.mxu1 %v948_v51  ;;  %1647 = vmatpush3.msra.mxu0 %v1324_v47  ;;  %v1336_v51 = vld [vmem:[#allocation9 + $0xd8] sm:$0xff] }
 0x1a3   :  { %1204 = vmatpush1.msra.mxu1 %v947_v52  ;;  %1648 = vmatprep.subr.mxu0 %v1339_v48  ;;  %v1320_v52 = vld [vmem:[#allocation9 + $0x58] sm:$0xff]  ;;  %v997_v48 = vld [vmem:[%s2134_s4] sm:$0x3] }
 0x1a4   :  { %1205 = vmatprep.subr.mxu1 %v946_v53  ;;  %v1319_v53 = vld [vmem:[#allocation9 + $0x50] sm:$0xff] }
 0x1a5   :  { %1206 = vmatpush1.msra.mxu1 %v945_v54  ;;  %v1334_v54 = vld [vmem:[#allocation9 + $0xc8] sm:$0xff] }
 0x1a6   :  { %1207 = vmatprep.subr.mxu1 %v944_v57  ;;  %v1318_v57 = vld [vmem:[#allocation9 + $0x48] sm:$0xff] }
 0x1a7   :  { %1208 = vmatpush1.msra.mxu1 %v943_v29  ;;  %v1333_v29 = vld [vmem:[#allocation9 + $0xc0] sm:$0xff] }
 0x1a8   :  { %1209 = vmatprep.subr.mxu1 %v942_v58  ;;  %v1317_v58 = vld [vmem:[#allocation9 + $0x40] sm:$0xff] }
 0x1a9   :  { %1210 = vmatpush1.msra.mxu1 %v941_v59  ;;  %v1332_v59 = vld [vmem:[#allocation9 + $0xb8] sm:$0xff] }
 0x1aa   :  { %1211 = vmatprep.subr.mxu1 %v940_v60  ;;  %v1316_v60 = vld [vmem:[#allocation9 + $0x38] sm:$0xff] }
 0x1ab   :  { %1212 = vmatpush1.msra.mxu1 %v939_v61  ;;  %v1331_v61 = vld [vmem:[#allocation9 + $0xb0] sm:$0xff] }
 0x1ac   :  { %1213 = vmatprep.subr.mxu1 %v938_v33  ;;  %v1315_v33 = vld [vmem:[#allocation9 + $0x30] sm:$0xff] }
 0x1ad   :  { %1214 = vmatpush1.msra.mxu1 %v937_v1  ;;  %v1330_v1 = vld [vmem:[#allocation9 + $0xa8] sm:$0xff] }
 0x1ae   :  { %1215 = vmatprep.subr.mxu1 %v936_v14  ;;  %v1314_v14 = vld [vmem:[#allocation9 + $0x28] sm:$0xff] }
 0x1af   :  { %1216 = vmatpush1.msra.mxu1 %v935_v19  ;;  %v1329_v19 = vld [vmem:[#allocation9 + $0xa0] sm:$0xff] }
 0x1b0   :  { %1217 = vmatprep.subr.mxu1 %v934_v18  ;;  %v1313_v18 = vld [vmem:[#allocation9 + $0x20] sm:$0xff] }
 0x1b1   :  { %1218 = vmatpush1.msra.mxu1 %v933_v63  ;;  %v1328_v63 = vld [vmem:[#allocation9 + $0x98] sm:$0xff] }
 0x1b2   :  { %1219 = vmatprep.subr.mxu1 %v996_v44  ;;  %v1312_v44 = vld [vmem:[#allocation9 + $0x18] sm:$0xff] }
 0x1b3   :  { %1220 = vmatpush2.msra.mxu1 %v995_v3  ;;  %v1327_v3 = vld [vmem:[#allocation9 + $0x90] sm:$0xff] }
 0x1b4   :  { %1221 = vmatprep.subr.mxu1 %v994_v24  ;;  %v1311_v24 = vld [vmem:[#allocation9 + $0x10] sm:$0xff] }
 0x1b5   :  { %1222 = vmatpush2.msra.mxu1 %v993_v27  ;;  %v1326_v27 = vld [vmem:[#allocation9 + $0x88] sm:$0xff] }
 0x1b6   :  { %1223 = vmatprep.subr.mxu1 %v992_v31  ;;  %v1310_v31 = vld [vmem:[#allocation9 + $0x8] sm:$0xff] }
 0x1b7   :  { %1224 = vmatpush2.msra.mxu1 %v991_v30  ;;  %v1325_v30 = vld [vmem:[#allocation9 + $0x80] sm:$0xff] }
 0x1b8   :  { %1225 = vmatprep.subr.mxu1 %v990_v37  ;;  %v1309_v37 = vld [vmem:[#allocation9] sm:$0xff] }
 0x1b9   :  { %1226 = vmatpush2.msra.mxu1 %v989_v5  ;;  %v1459_v5 = vld [vmem:[#allocation11 + $0xf8] sm:$0xff] }
 0x1ba   :  { %1227 = vmatprep.subr.mxu1 %v988_v6  ;;  %v1458_v6 = vld [vmem:[#allocation11 + $0xf0] sm:$0xff] }
 0x1bb   :  { %1228 = vmatpush2.msra.mxu1 %v987_v8  ;;  %v1457_v8 = vld [vmem:[#allocation11 + $0xe8] sm:$0xff] }
 0x1bc   :  { %1229 = vmatprep.subr.mxu1 %v986_v9  ;;  %v1456_v9 = vld [vmem:[#allocation11 + $0xe0] sm:$0xff] }
 0x1bd   :  { %1230 = vmatpush2.msra.mxu1 %v985_v10  ;;  %v1455_v10 = vld [vmem:[#allocation11 + $0xd8] sm:$0xff] }
 0x1be   :  { %1231 = vmatprep.subr.mxu1 %v984_v0  ;;  %v1454_v0 = vld [vmem:[#allocation11 + $0xd0] sm:$0xff] }
 0x1bf   :  { %1232 = vmatpush2.msra.mxu1 %v983_v55  ;;  %v1453_v55 = vld [vmem:[#allocation11 + $0xc8] sm:$0xff] }
 0x1c0   :  { %1233 = vmatprep.subr.mxu1 %v982_v11  ;;  %v1452_v11 = vld [vmem:[#allocation11 + $0xc0] sm:$0xff] }
 0x1c1   :  { %1234 = vmatpush2.msra.mxu1 %v981_v12  ;;  %v1451_v12 = vld [vmem:[#allocation11 + $0xb8] sm:$0xff] }
 0x1c2   :  { %1235 = vmatprep.subr.mxu1 %v980_v13  ;;  %v1450_v13 = vld [vmem:[#allocation11 + $0xb0] sm:$0xff] }
 0x1c3   :  { %1236 = vmatpush2.msra.mxu1 %v979_v15  ;;  %v1449_v15 = vld [vmem:[#allocation11 + $0xa8] sm:$0xff] }
 0x1c4   :  { %1237 = vmatprep.subr.mxu1 %v978_v16  ;;  %v1448_v16 = vld [vmem:[#allocation11 + $0xa0] sm:$0xff] }
 0x1c5   :  { %1238 = vmatpush2.msra.mxu1 %v977_v56  ;;  %v1447_v56 = vld [vmem:[#allocation11 + $0x98] sm:$0xff] }
 0x1c6   :  { %1239 = vmatprep.subr.mxu1 %v976_v17  ;;  %v1446_v17 = vld [vmem:[#allocation11 + $0x90] sm:$0xff] }
 0x1c7   :  { %1240 = vmatpush2.msra.mxu1 %v975_v20  ;;  %v1445_v20 = vld [vmem:[#allocation11 + $0x88] sm:$0xff] }
 0x1c8   :  { %1241 = vmatprep.subr.mxu1 %v974_v21  ;;  %v1444_v21 = vld [vmem:[#allocation11 + $0x80] sm:$0xff] }
 0x1c9   :  { %1242 = vmatpush2.msra.mxu1 %v973_v22  ;;  %v1443_v22 = vld [vmem:[#allocation11 + $0x78] sm:$0xff] }
 0x1ca   :  { %1243 = vmatprep.subr.mxu1 %v972_v25  ;;  %v1442_v25 = vld [vmem:[#allocation11 + $0x70] sm:$0xff] }
 0x1cb   :  { %1244 = vmatpush2.msra.mxu1 %v971_v26  ;;  %v1441_v26 = vld [vmem:[#allocation11 + $0x68] sm:$0xff] }
 0x1cc   :  { %1245 = vmatprep.subr.mxu1 %v970_v28  ;;  %v1440_v28 = vld [vmem:[#allocation11 + $0x60] sm:$0xff] }
 0x1cd   :  { %1246 = vmatpush2.msra.mxu1 %v969_v34  ;;  %v1439_v34 = vld [vmem:[#allocation11 + $0x58] sm:$0xff] }
 0x1ce   :  { %1247 = vmatprep.subr.mxu1 %v968_v35  ;;  %v1438_v35 = vld [vmem:[#allocation11 + $0x50] sm:$0xff] }
 0x1cf   :  { %1248 = vmatpush2.msra.mxu1 %v967_v39  ;;  %v1437_v39 = vld [vmem:[#allocation11 + $0x48] sm:$0xff] }
 0x1d0   :  { %1249 = vmatprep.subr.mxu1 %v966_v40 }
 0x1d1   :  { %1250 = vmatpush2.msra.mxu1 %v965_v32 }
 0x1d2   :  { %1252 = vmatmul.mubr.f32.vlgmr.msra.gmra.mxu1 %v2055_v62  ;;  %v1323_v62 = vld [vmem:[#allocation9 + $0x70] sm:$0xff]  ;;  %1472 = vmatprep.subr.mxu1 %v1459_v5 }
 0x1d3   :  { %1257 = vmatprep.mubr.f32.mxu1 %v792_v41  ;;  %1649 = vmatpush3.msra.mxu0 %v1323_v62 }
 0x1d4   :  { %1650 = vmatprep.subr.mxu0 %v1338_v49  ;;  %1473 = vmatpush1.msra.mxu1 %v1458_v6 }
 0x1d5   :  { %1651 = vmatpush3.msra.mxu0 %v1322_v50  ;;  %1474 = vmatprep.subr.mxu1 %v1457_v8  ;;  %v1002_v50 = vrot.slane %v997_v48, %v2043_v4 }
 0x1d6   :  { %1258 = vmatmul.mubr.f32.gmra.mxu1 %v791_v42 }
 0x1d7   :  { %1263 = vmatprep.mubr.f32.mxu1 %v2067_v38  ;;  %v1337_v38 = vld [vmem:[#allocation9 + $0xe0] sm:$0xff]  ;;  %1475 = vmatpush1.msra.mxu1 %v1456_v9 }
 0x1d8   :  { %1652 = vmatprep.subr.mxu0 %v1337_v38  ;;  %1476 = vmatprep.subr.mxu1 %v1455_v10 }
 0x1d9   :  { %1477 = vmatpush1.msra.mxu1 %v1454_v0 }
 0x1da   :  { %1264 = vmatmul.mubr.f32.gmra.mxu1 %v2063_v23  ;;  %v1321_v23 = vld [vmem:[#allocation9 + $0x60] sm:$0xff]  ;;  %1478 = vmatprep.subr.mxu1 %v1453_v55 }
 0x1db   :  { %1269 = vmatprep.mubr.f32.mxu1 %v804_v36  ;;  %1653 = vmatpush3.msra.mxu0 %v1321_v23  ;;  %v1006_v23 = vrot.slane %v997_v48, %v2049_v7 }
 0x1dc   :  { %1654 = vmatprep.subr.mxu0 %v1336_v51  ;;  %1479 = vmatpush1.msra.mxu1 %v1452_v11 }
 0x1dd   :  { %1655 = vmatpush3.msra.mxu0 %v1320_v52  ;;  %1480 = vmatprep.subr.mxu1 %v1451_v12 }
 0x1de   :  { %1270 = vmatmul.mubr.f32.gmra.mxu1 %v803_v43 }
 0x1df   :  { %1536 = vmatprep.mubr.f32.mxu1 %v1846_v2  ;;  %v1335_v2 = vld [vmem:[#allocation9 + $0xd0] sm:$0xff]  ;;  %1481 = vmatpush1.msra.mxu1 %v1450_v13 }
 0x1e0   :  { %1656 = vmatprep.subr.mxu0 %v1335_v2  ;;  %1482 = vmatprep.subr.mxu1 %v1449_v15 }
 0x1e1   :  { %1657 = vmatpush3.msra.mxu0 %v1319_v53  ;;  %1483 = vmatpush1.msra.mxu1 %v1448_v16 }
 0x1e2   :  { %1658 = vmatprep.subr.mxu0 %v1334_v54  ;;  %1484 = vmatprep.subr.mxu1 %v1447_v56 }
 0x1e3   :  { %1659 = vmatpush3.msra.mxu0 %v1318_v57  ;;  %1485 = vmatpush1.msra.mxu1 %v1446_v17 }
 0x1e4   :  { %1660 = vmatprep.subr.mxu0 %v1333_v29  ;;  %1486 = vmatprep.subr.mxu1 %v1445_v20 }
 0x1e5   :  { %1661 = vmatpush3.msra.mxu0 %v1317_v58  ;;  %1487 = vmatpush1.msra.mxu1 %v1444_v21 }
 0x1e6   :  { %1662 = vmatprep.subr.mxu0 %v1332_v59  ;;  %1488 = vmatprep.subr.mxu1 %v1443_v22 }
 0x1e7   :  { %1663 = vmatpush3.msra.mxu0 %v1316_v60  ;;  %1489 = vmatpush1.msra.mxu1 %v1442_v25 }
 0x1e8   :  { %1664 = vmatprep.subr.mxu0 %v1331_v61  ;;  %1490 = vmatprep.subr.mxu1 %v1441_v26 }
 0x1e9   :  { %1665 = vmatpush3.msra.mxu0 %v1315_v33  ;;  %1491 = vmatpush1.msra.mxu1 %v1440_v28 }
 0x1ea   :  { %1666 = vmatprep.subr.mxu0 %v1330_v1  ;;  %1492 = vmatprep.subr.mxu1 %v1439_v34 }
 0x1eb   :  { %1667 = vmatpush3.msra.mxu0 %v1314_v14  ;;  %1493 = vmatpush1.msra.mxu1 %v1438_v35 }
 0x1ec   :  { %1668 = vmatprep.subr.mxu0 %v1329_v19  ;;  %1494 = vmatprep.subr.mxu1 %v1437_v39 }
 0x1ed   :  { %1669 = vmatpush3.msra.mxu0 %v1313_v18 }
 0x1ee   :  { %1670 = vmatprep.subr.mxu0 %v1328_v63 }
 0x1ef   :  { %1671 = vmatpush3.msra.mxu0 %v1312_v44 }
 0x1f0   :  { %1672 = vmatprep.subr.mxu0 %v1327_v3 }
 0x1f1   :  { %1673 = vmatpush3.msra.mxu0 %v1311_v24 }
 0x1f2   :  { %1674 = vmatprep.subr.mxu0 %v1326_v27 }
 0x1f3   :  { %1675 = vmatpush3.msra.mxu0 %v1310_v31 }
 0x1f4   :  { %1676 = vmatprep.subr.mxu0 %v1325_v30 }
 0x1f5   :  { %1677 = vmatpush3.msra.mxu0 %v1309_v37 }
 0x248   :  { %v1164_v36 = vpop.f32.mrf.mxu0 }
 0x24a   :  { %v1166_v46 = vpop.f32.mrf.mxu0 }
 0x24c   :  { %v1170_v62 = vpop.f32.mrf.mxu0 }
 0x24e   :  { %v1172_v38 = vpop.f32.mrf.mxu0 }
 0x251   :  { %v1176_v53 = vpop.f32.mrf.mxu0 }
 0x252   :  { %v1075_v40 = vpop.f32.mrf.mxu1 }
 0x253   :  { %v1076_v52 = vadd.f32 %v1075_v40, %v1002_v50  ;;  %v1178_v61 = vpop.f32.mrf.mxu0 }
 0x254   :  { %v1077_v32 = vpop.f32.mrf.mxu1 }
 0x255   :  { %v1078_v57 = vadd.f32 %v1077_v32, %v1006_v23  ;;  %v1165_v59 = vadd.f32 %v1164_v36, %v1076_v52  ;;  %v1182_v30 = vpop.f32.mrf.mxu0 }
 0x256   :  { %v1081_v41 = vpop.f32.mrf.mxu1 }
 0x257   :  { %v1082_v2 = vadd.f32 %v1081_v41, %v1002_v50  ;;  %v1167_v14 = vadd.f32 %v1166_v46, %v1078_v57  ;;  %v1184_v12 = vpop.f32.mrf.mxu0 }
 0x258   :  { %v1083_v42 = vpop.f32.mrf.mxu1 }
 0x259   :  { %v1084_v29 = vadd.f32 %v1083_v42, %v1006_v23  ;;  %v1171_v60 = vadd.f32 %v1170_v62, %v1082_v2 }
 0x25b   :  { %v1173_v18 = vadd.f32 %v1172_v38, %v1084_v29 }
 0x25c   :  { %v1087_v43 = vpop.f32.mrf.mxu1 }
 0x25d   :  { %v1088_v63 = vadd.f32 %v1087_v43, %v1002_v50 }
 0x25e   :  { %v1089_v47 = vpop.f32.mrf.mxu1 }
 0x25f   :  { %v1090_v37 = vadd.f32 %v1089_v47, %v1006_v23  ;;  %v1177_v55 = vadd.f32 %v1176_v53, %v1088_v63  ;;  %v1432_v63 = vld [vmem:[#allocation11 + $0x20] sm:$0xff] }
 0x260   :  { %v1093_v49 = vpop.f32.mrf.mxu1 }
 0x261   :  { %v1094_v3 = vadd.f32 %v1093_v49, %v1002_v50  ;;  %v1179_v15 = vadd.f32 %v1178_v61, %v1090_v37  ;;  %v1436_v61 = vld [vmem:[#allocation11 + $0x40] sm:$0xff] }
 0x262   :  { %v1095_v51 = vpop.f32.mrf.mxu1  ;;  %1495 = vmatpush1.msra.mxu1 %v1436_v61  ;;  %v1705_v61 = vld [vmem:[#allocation3 + $0x20] sm:$0xff] }
 0x263   :  { %v1096_v6 = vadd.f32 %v1095_v51, %v1006_v23  ;;  %v1183_v11 = vadd.f32 %v1182_v30, %v1094_v3  ;;  %v1430_v3 = vld [vmem:[#allocation11 + $0x10] sm:$0xff]  ;;  %v1428_v30 = vld [vmem:[#allocation11] sm:$0xff] }
 0x265   :  { %v1185_v21 = vadd.f32 %v1184_v12, %v1096_v6 }
 0x292   :  { %v1253_v54 = vpop.f32.mrf.mxu1 }
 0x293   :  { %v2079_v1 = vadd.f32 %v1253_v54, %v1165_v59 }
 0x294   :  { %v1255_v58 = vpop.f32.mrf.mxu1 }
 0x295   :  { %v2083_v24 = vadd.f32 %v1255_v58, %v1167_v14  ;;  %v1434_v14 = vld [vmem:[#allocation11 + $0x30] sm:$0xff] }
 0x296   :  { %v1259_v33 = vpop.f32.mrf.mxu1 }
 0x297   :  { %v2081_v19 = vadd.f32 %v1259_v33, %v1171_v60  ;;  %v1435_v33 = vld [vmem:[#allocation11 + $0x38] sm:$0xff] }
 0x298   :  { %v1261_v44 = vpop.f32.mrf.mxu1  ;;  %1496 = vmatprep.subr.mxu1 %v1435_v33  ;;  %v1706_v33 = vld [vmem:[#allocation3 + $0x28] sm:$0xff] }
 0x299   :  { %v1276_v27 = vadd.f32 %v2081_v19, %v2079_v1  ;;  %v2087_v31 = vadd.f32 %v1261_v44, %v1173_v18  ;;  %1497 = vmatpush1.msra.mxu1 %v1434_v14  ;;  %v1433_v18 = vld [vmem:[#allocation11 + $0x28] sm:$0xff]  ;;  %v1431_v44 = vld [vmem:[#allocation11 + $0x18] sm:$0xff] }
 0x29a   :  { %v1265_v5 = vpop.f32.mrf.mxu1  ;;  %1498 = vmatprep.subr.mxu1 %v1433_v18  ;;  %v1707_v18 = vld [vmem:[#allocation3 + $0x30] sm:$0xff] }
 0x29b   :  { %v1277_v8 = vrot.slane %v1276_v27, 4  ;;  %v1283_v9 = vadd.f32 %v2087_v31, %v2083_v24  ;;  %v2091_v17 = vadd.f32 %v1265_v5, %v1177_v55  ;;  %1499 = vmatpush1.msra.mxu1 %v1432_v63  ;;  %v1643_v5 = vld [vmem:[%s2136_s6] ss:$0 sm:$0xff]  ;;  %s1848_s6 = smov [#allocation12]   ;;  %v1708_v63 = vld [vmem:[#allocation3 + $0x38] sm:$0xff] }
 0x29c   :  { %v1267_v10 = vpop.f32.mrf.mxu1  ;;  %1500 = vmatprep.subr.mxu1 %v1431_v44 }
 0x29d   :  { %v1284_v0 = vrot.slane %v1283_v9, 4  ;;  %v1278_v13 = vadd.f32 %v1277_v8, %v1276_v27  ;;  %v2095_v26 = vadd.f32 %v1267_v10, %v1179_v15  ;;  %1501 = vmatpush1.msra.mxu1 %v1430_v3  ;;  %v1429_v27 = vld [vmem:[#allocation11 + $0x8] sm:$0xff] }
 0x29e   :  { %v1271_v16 = vpop.f32.mrf.mxu1  ;;  %1502 = vmatprep.subr.mxu1 %v1429_v27 }
 0x29f   :  { %v1285_v56 = vadd.f32 %v1284_v0, %v1283_v9  ;;  %v2093_v20 = vadd.f32 %v1271_v16, %v1183_v11  ;;  %v1279_v35 = vrot.slane %v1278_v13, 2  ;;  %1503 = vmatpush1.msra.mxu1 %v1428_v30  ;;  %v1460_v0 = vld [vmem:[%s2138_s8] sm:$0x3]  ;;  %s1629_s8 = sshll.u32 %s1848_s6, 4  ;;  %s1630_s8 = int_to_ptr.vmem [resolvable:$true] %s1629_s8 }
 0x2a0   :  { %v1273_v22 = vpop.f32.mrf.mxu1  ;;  %v1465_v55 = vrot.slane %v1460_v0, %v2043_v4  ;;  %v1469_v11 = vrot.slane %v1460_v0, %v2049_v7  ;;  %s1809_s20 = scalar_lea.vmem %s1630_s8, 1024  ;;  %p1814_p12 = scmp.lt.s32.totalorder %s1630_s8, %s1630_s8 }
 0x2a1   :  { %v1286_v25 = vrot.slane %v1285_v56, 2  ;;  %v1290_v28 = vadd.f32 %v2093_v20, %v2091_v17  ;;  %v2099_v34 = vadd.f32 %v1273_v22, %v1185_v21  ;;  %v1280_v36 = vadd.f32 %v1279_v35, %v1278_v13  ;;  %p1810_p11 = scmp.ne.s32.totalorder %s1630_s8, %s1809_s20  ;;  %p1815_p13 = scmp.lt.s32.totalorder %s1809_s20, %s1809_s20 }
 0x2a3   :  { %v1291_v39 = vrot.slane %v1290_v28, 4  ;;  %v1297_v40 = vadd.f32 %v2099_v34, %v2095_v26  ;;  %v1287_v32 = vadd.f32 %v1286_v25, %v1285_v56  ;;  %v1281_v49 = vrot.slane %v1280_v36, 1  ;;  %p1816_p0 = por %p1815_p13, %p1814_p12 }
 0x2a5   :  { %v1292_v41 = vadd.f32 %v1291_v39, %v1290_v28  ;;  %v1298_v42 = vrot.slane %v1297_v40, 4  ;;  %v1288_v47 = vrot.slane %v1287_v32, 1  ;;  %v1282_v2 = vadd.f32 %v1281_v49, %v1280_v36  ;;  %p1817_p1 = pnand %p1816_p0, %p1810_p11 }
 0x2a6   :  { %v1847_v39 = vmov 1966171168  }
 0x2a7   :  { %v1293_v43 = vrot.slane %v1292_v41, 2  ;;  %v1299_v46 = vadd.f32 %v1298_v42, %v1297_v40  ;;  %v1289_v52 = vadd.f32 %v1288_v47, %v1287_v32  ;;  %v1305_v58 = vmul.f32 0.0625, %v1282_v2 }
 0x2a8   :  { %v1559_v40 = vunpack.c.l.s4 %v1847_v39 }
 0x2a9   :  { %v1294_v48 = vadd.f32 %v1293_v43, %v1292_v41  ;;  %v1300_v62 = vrot.slane %v1299_v46, 2  ;;  %v1306_v57 = vmul.f32 0.0625, %v1289_v52 }
 0x2aa   :  { %v1560_v32 = vunpack.c.0.s8 %v1559_v40 }
 0x2ab   :  { %v1295_v50 = vrot.slane %v1294_v48, 1  ;;  %v1301_v38 = vadd.f32 %v1300_v62, %v1299_v46 }
 0x2ac   :  { %v1563_v42 = vsub.s32 %v1560_v32, %v2040_v45 }
 0x2ad   :  { %v1296_v23 = vadd.f32 %v1295_v50, %v1294_v48  ;;  %v1302_v51 = vrot.slane %v1301_v38, 1 }
 0x2af   :  { %v1303_v53 = vadd.f32 %v1302_v51, %v1301_v38  ;;  %v1307_v54 = vmul.f32 0.0625, %v1296_v23 }
 0x2b1   :  { %v1308_v29 = vmul.f32 0.0625, %v1303_v53  ;;  %v1353_v60 = vsel %vm1352_vm3, %v1307_v54, %v1305_v58  ;;  %v1702_v58 = vld [vmem:[#allocation3 + $0x8] sm:$0xff] }
 0x2b3   :  { %v1354_v59 = vsel %vm1352_vm3, %v1308_v29, %v1306_v57  ;;  %v1701_v29 = vld [vmem:[#allocation3] sm:$0xff] }
 0x2b4   :  { %1421 = vmatprep.mubr.f32.mxu0 %v1354_v59  ;;  %v1703_v59 = vld [vmem:[#allocation3 + $0x10] sm:$0xff] }
 0x2b5   :  { %1422 = vmatmul.mubr.f32.vlgmr.msra.gmra.mxu0 %v1353_v60  ;;  %v1704_v60 = vld [vmem:[#allocation3 + $0x18] sm:$0xff] }
 0x375   :  { %v1678_v37 = vpop.f32.mrf.mxu0 }
 0x377   :  { %v1679_v6 = vpop.f32.mrf.mxu0 }
 0x378   :  { %v1680_v8 = vadd.f32 %v1679_v6, %v1678_v37 }
 0x37a   :  { %v1424_v9 = vadd.f32 %v1680_v8, %v1643_v5 }
 0x37c   :  { %v1427_v10 = vmax.f32 %v1424_v9, 0.0 }
 0x37e   :  { %1537 = vmatmul.mubr.f32.vlgmr.msra.gmra.mxu1 %v1427_v10 }
 0x43e   :  { %v1538_v12 = vpop.f32.mrf.mxu1 }
 0x43f   :  { %v1539_v13 = vadd.f32 %v1538_v12, %v1465_v55 }
 0x440   :  { %v1540_v15 = vpop.f32.mrf.mxu1 }
 0x441   :  { %v1644_v16 = vmul.f32 -1.442695, %v1539_v13  ;;  %v1541_v56 = vadd.f32 %v1540_v15, %v1469_v11 }
 0x443   :  { %1693 = vpow2.f32 %v1644_v16  ;;  %v1645_v21 = vmul.f32 -1.442695, %v1541_v56 }
 0x445   :  { %1695 = vpow2.f32 %v1645_v21 }
 0x450   :  { %v1694_v22 = vpop.eup %1693 }
 0x451   :  { %v1549_v25 = vadd.f32 1.0, %v1694_v22 }
 0x452   :  { %v1696_v28 = vpop.eup %1695 }
 0x453   :  { %v1550_v35 = vadd.f32 1.0, %v1696_v28  ;;  %1697 = vrcp.f32 %v1549_v25 }
 0x455   :  { %1699 = vrcp.f32 %v1550_v35 }
 0x460   :  { %v1698_v41 = vpop.eup %1697 }
 0x462   :  { %v1700_v36 = vpop.eup %1699 }
 0x463   :  { %v1557_v43 = vcombine.low %v1698_v41, %v1700_v36 }
 0x465   :  { %v1564_v46 = vrot.slane %v1557_v43, %v1563_v42 }
 0x467   :  { %v1565_v47 = vcombine.high %v1564_v46, %v1564_v46  ;;  %v1572_v48 = vrot.slane %v1564_v46, %v1563_v42 }
 0x469   :  { %v1579_v62 = vrot.slane %v1565_v47, %v1563_v42  ;;  %v1583_v49 = vrot.slane %v1572_v48, %v2043_v4  ;;  %v1587_v50 = vrot.slane %v1572_v48, %v2049_v7 }
 0x46b   :  { %v1591_v38 = vrot.slane %v1579_v62, %v2043_v4  ;;  %v1595_v23 = vrot.slane %v1579_v62, %v2049_v7  ;;  %v1600_v51 = vmul.f32 %v1583_v49, %v2079_v1  ;;  %v1601_v52 = vmul.f32 %v1587_v50, %v2083_v24 }
 0x46c   :  { %v1602_v45 = vmul.f32 %v1583_v49, %v2081_v19  ;;  %v1603_v2 = vmul.f32 %v1587_v50, %v2087_v31 }
 0x46d   :  { %v1604_v53 = vmul.f32 %v1591_v38, %v2091_v17  ;;  %v1605_v54 = vmul.f32 %v1595_v23, %v2095_v26  ;;  %v1606_v57 = vmul.f32 %v1591_v38, %v2093_v20  ;;  %v1607_v4 = vmul.f32 %v1595_v23, %v2099_v34 }
 0x46e   :  { %v1608_v7 = vadd.f32 %v1701_v29, %v1600_v51  ;;  %v1609_v1 = vadd.f32 %v1702_v58, %v1601_v52  ;;  %v1610_v24 = vadd.f32 %v1703_v59, %v1602_v45  ;;  %v1611_v19 = vadd.f32 %v1704_v60, %v1603_v2 }
 0x46f   :  { %v1612_v31 = vadd.f32 %v1705_v61, %v1604_v53  ;;  %v1613_v14 = vadd.f32 %v1706_v33, %v1605_v54  ;;  %v1614_v17 = vadd.f32 %v1707_v18, %v1606_v57  ;;  %v1615_v26 = vadd.f32 %v1708_v63, %v1607_v4 }
 0x470   :  { %1616 = vst [vmem:[#allocation12] sm:$0xff] %v1608_v7  ;;  %1617 = vst [vmem:[#allocation12 + $0x8] sm:$0xff] %v1609_v1 }
 0x471   :  { %1618 = vst [vmem:[#allocation12 + $0x10] sm:$0xff] %v1610_v24  ;;  %1619 = vst [vmem:[#allocation12 + $0x18] sm:$0xff] %v1611_v19 }
 0x472   :  { %1620 = vst [vmem:[#allocation12 + $0x20] sm:$0xff] %v1612_v31  ;;  %1621 = vst [vmem:[#allocation12 + $0x28] sm:$0xff] %v1613_v14 }
 0x473   :  { %1622 = vst [vmem:[#allocation12 + $0x30] sm:$0xff] %v1614_v17  ;;  %1623 = vst [vmem:[#allocation12 + $0x38] sm:$0xff] %v1615_v26 }
 0x474   :  { %1820 = shalt.err (!%p1817_p1)
}
 0x475   :  { %1635 = dma.vmem_to_hbm [thread:$0]  %s1630_s8, 1024, %s2139_s9, [#allocation5], %s1839_s14, %s1839_s14, %s1840_s15  }
 0x476   :  { %1835 = dma.done.wait [#allocation5], 1024  }
 0x477   :  { %1836 = vsyncadd [#allocation5], 4294966272 }
 0x478   :  { %1639 = vsyncpa [#allocation4], 1 }
 0x479   :  { %1640 = vsyncpa [#allocation7], 1 }
 0x47a   :  { %1641 = vsyncpa [#allocation10], 1 }
 0x47b   :  { %1642 = vsyncpa [#allocation5], 1 }

</bundles_post_ra>
